<compile_context>
chip_gen: v7x
topology: tpu7x:2x2x1
jax: 0.10.0
libtpu: 0.0.40
codegen_flags: <defaults>
</compile_context>

<pallas_src>
import jax
import jax.numpy as jnp
import numpy as np
from jax.experimental import pallas as pl
from jax.experimental.pallas import tpu as pltpu


# ---------------------------------------------------------------------------
# Kernel
# ---------------------------------------------------------------------------
def nec_kernel(node_feats_ref, coords_ref, edge_attr_ref, row_ref, col_ref,
               w1e_i_ref, w1e_j_ref, w1e_a_ref, w1e_r_ref, b1e_ref, w2e_ref, b2e_ref,
               wc1_ref, bc1_ref, wc2_ref, wcm_ref, bcm_ref,
               w1n_x_ref, w1n_a_ref, w1n_c_ref, b1n_ref, w2n_ref, b2n_ref,
               edge_out_ref, nodecoord_out_ref,
               slab_i_ref, slab_j_ref, agg_ref, ids_ref):
    f32 = jnp.float32
    bf16 = jnp.bfloat16
    step = pl.program_id(0)
    CP = coords_ref.shape[1]          # padded coord lane width (128)

    # ---- step 0: hoist node-side projections (bf16 slabs, width exactly H),
    #              zero the accumulator, and build the reusable iota. ----
    @pl.when(step == 0)
    def _init():
        x = node_feats_ref[...]
        slab_i_ref[...] = jnp.dot(x, w1e_i_ref[...],
                                  preferred_element_type=f32).astype(bf16)
        slab_j_ref[...] = jnp.dot(x, w1e_j_ref[...],
                                  preferred_element_type=f32).astype(bf16)
        agg_ref[...] = jnp.zeros_like(agg_ref)
        ids_ref[...] = jax.lax.broadcasted_iota(jnp.int32, ids_ref.shape, 1)

    # ---- per edge-tile work ----
    row = row_ref[...]                # (tile_e, 1) int32; -1 marks padding edges
    col = col_ref[...]
    ea = edge_attr_ref[...]           # (tile_e, Fe)
    ids = ids_ref[...]                # (tile_e, N) hoisted iota

    # One-hot selectors.  f32 versions feed the exact coord-diff gather and the exact
    # f32 scatter; bf16 versions (0/1 exact) feed the heavy feature gathers.
    oh_i_f32 = (ids == row).astype(f32)
    oh_j_f32 = (ids == col).astype(f32)
    oh_i_bf = oh_i_f32.astype(bf16)
    oh_j_bf = oh_j_f32.astype(bf16)

    # Heavy gathers in bf16 (dominant MXU work), f32 accumulation.
    xpi = jnp.dot(oh_i_bf, slab_i_ref[...], preferred_element_type=f32)   # (tile_e, H)
    xpj = jnp.dot(oh_j_bf, slab_j_ref[...], preferred_element_type=f32)

    # coord_to_radial: one f32 difference-selector matmul; coords_pad lanes 3+ are zero,
    # so the sum over all CP lanes equals the sum over the 3 real coord lanes.
    coord_diffs = jnp.dot(oh_i_f32 - oh_j_f32, coords_ref[...],
                          preferred_element_type=f32)                     # (tile_e, CP)
    radial = jnp.sum(coord_diffs * coord_diffs, axis=-1, keepdims=True)   # (tile_e, 1)
    normed_diffs = coord_diffs / (jnp.sqrt(radial) + 1.0)                 # lanes 3+ stay 0

    # edge_model: concat-split Linear -> ReLU -> Linear (lane-dense, width-128 output;
    # padded columns of w2e/b2e are zero so the padding lanes are exactly 0).
    h_e = (xpi + xpj
           + jnp.dot(ea, w1e_a_ref[...], preferred_element_type=f32)
           + radial * w1e_r_ref[...]                 # (tile_e,1)*(1,H): VPU broadcast
           + b1e_ref[...])
    h_e = jnp.maximum(h_e, 0.0)
    edge_out = jnp.dot(h_e, w2e_ref[...], preferred_element_type=f32) + b2e_ref[...]
    edge_out_ref[...] = edge_out                      # (tile_e, FeP) lane-dense store

    # coord_edge_mlp: Linear(Fe,2) -> ReLU -> Linear(2,1, no bias); the 2->1 stage is
    # VPU broadcast-mul-adds (keeps a near-empty matmul off the MXU hot loop).
    h_c = jnp.maximum(
        jnp.dot(edge_out, wc1_ref[...], preferred_element_type=f32) + bc1_ref[...], 0.0)
    wc2 = wc2_ref[...]                                # (2, 1)
    e_c = h_c[:, 0:1] * wc2[0:1, :] + h_c[:, 1:2] * wc2[1:2, :]           # (tile_e, 1)
    trans = normed_diffs * e_c                                            # (tile_e, CP)

    # Fused, transpose-free scatter-add of [trans | edge_out] (256 lane-dense columns)
    # into the node accumulator: contract the edge axis of the one-hot directly.
    # Kept in f32 so the segment sums match a strict f32 reference.
    scat = jnp.concatenate([trans, edge_out], axis=1)                     # (tile_e, CP+FeP)
    agg_ref[...] += jax.lax.dot_general(
        oh_i_f32, scat,
        dimension_numbers=(((0,), (0,)), ((), ())),
        preferred_element_type=f32)                                       # (N, CP+FeP)

    # ---- last step: coord_model tail + node_model (runs once; small masked stores OK) ----
    @pl.when(step == pl.num_programs(0) - 1)
    def _finalize():
        x = node_feats_ref[...]
        agg = agg_ref[...]
        coords3 = coords_ref[...][:, :3]
        coords_new = coords3 + agg[:, :3]                                 # scatter of trans
        coord_out = jnp.dot(coords_new, wcm_ref[...],
                            preferred_element_type=f32) + bcm_ref[...]
        agg_e = agg[:, CP:]                                               # scatter of edge_out

        h_n = (jnp.dot(x, w1n_x_ref[...], preferred_element_type=f32)
               + jnp.dot(agg_e, w1n_a_ref[...], preferred_element_type=f32)
               + jnp.dot(coord_out, w1n_c_ref[...], preferred_element_type=f32)
               + b1n_ref[...])
        h_n = jnp.maximum(h_n, 0.0)
        node_out = jnp.dot(h_n, w2n_ref[...], preferred_element_type=f32) + b2n_ref[...]
        nodecoord_out_ref[...] = jnp.concatenate([node_out, coord_out], axis=1)


# ---------------------------------------------------------------------------
# Wrapper
# ---------------------------------------------------------------------------
LANE = 128


def _round_up(x, m):
    return ((x + m - 1) // m) * m


def _pad_axis(a, axis, to):
    pad = to - a.shape[axis]
    if pad <= 0:
        return a
    cfg = [(0, 0)] * a.ndim
    cfg[axis] = (0, pad)
    return jnp.pad(a, cfg)


def _vmem_budget_bytes(N, Fn, Fe, H, CP, FeP, tile_e, out_w, weights):
    """Rough VMEM footprint (physical (sublane,128) tiling, 2x for double buffering)."""
    def tiled(r, c, itemsize, sub=8):
        return _round_up(max(r, 1), sub) * _round_up(max(c, 1), LANE) * itemsize
    scratch = (2 * tiled(N, H, 2, sub=16)          # bf16 slabs
               + tiled(N, CP + FeP, 4)             # accumulator
               + tiled(tile_e, N, 4))              # hoisted iota
    streams = 2 * (tiled(tile_e, Fe, 4) + 2 * tiled(tile_e, 1, 4) + tiled(tile_e, FeP, 4))
    resident = 2 * (tiled(N, Fn, 4) + tiled(N, CP, 4) + tiled(N, out_w, 4))
    wbytes = 2 * sum(tiled(w.shape[0], w.shape[1], 4) for w in weights)
    return scratch + streams + resident + wbytes


def node_edge_coord_forward(node_feats, edge_index, edge_attr, coords, params, *, tile_e=256):
    f32 = jnp.float32
    node_feats = node_feats.astype(f32)
    edge_attr = edge_attr.astype(f32)
    coords = coords.astype(f32)

    N, Fn = node_feats.shape
    E, Fe = edge_attr.shape
    h_nf = params["w1e_i"].shape[1]
    out_nf = params["w2n"].shape[1]

    H = _round_up(h_nf, LANE)      # padded hidden width
    FeP = _round_up(Fe, LANE)      # padded edge-feature lane width (lane-dense edge_out)
    CP = _round_up(3, LANE)        # padded coord lane width
    HCp = _round_up(params["wc1"].shape[1], LANE)

    # Zero-padding of weights is numerically exact.
    p = {k: v.astype(f32) for k, v in params.items()}
    for k in ("w1e_i", "w1e_j", "w1e_a", "w1e_r", "b1e",
              "w1n_x", "w1n_a", "w1n_c", "b1n"):
        p[k] = _pad_axis(p[k], 1, H)
    p["w2e"] = _pad_axis(_pad_axis(p["w2e"], 0, H), 1, FeP)
    p["b2e"] = _pad_axis(p["b2e"], 1, FeP)
    p["wc1"] = _pad_axis(_pad_axis(p["wc1"], 0, FeP), 1, HCp)
    p["bc1"] = _pad_axis(p["bc1"], 1, HCp)
    p["w1n_a"] = _pad_axis(p["w1n_a"], 0, FeP)
    p["w2n"] = _pad_axis(p["w2n"], 0, H)

    # Coordinates lane-padded to 128 (lanes 3+ are zero -> radial stays exact).
    coords_pad = _pad_axis(coords, 1, CP)

    # Edge tiling: >=16 rows (bf16 sublane packing), multiple of 16; padded edges get
    # index -1 (match no node) so they gather zeros and scatter nothing.
    tile_e = int(min(tile_e, _round_up(E, 16)))
    tile_e = max(16, _round_up(tile_e, 16))
    e_pad = _round_up(E, tile_e)
    pe = e_pad - E
    edge_attr_p = jnp.pad(edge_attr, ((0, pe), (0, 0)))
    row = jnp.pad(edge_index[0].astype(jnp.int32), (0, pe),
                  constant_values=-1).reshape(e_pad, 1)
    col = jnp.pad(edge_index[1].astype(jnp.int32), (0, pe),
                  constant_values=-1).reshape(e_pad, 1)

    grid = (e_pad // tile_e,)

    def full_spec(shape):
        return pl.BlockSpec(shape, lambda i: (0,) * len(shape))

    def etile_spec(feat):
        # NOTE: at realistic E, add pipeline_mode=pl.Buffered(3) here (v5e benefits most).
        return pl.BlockSpec((tile_e, feat), lambda i: (i, 0))

    weight_keys = ("w1e_i", "w1e_j", "w1e_a", "w1e_r", "b1e", "w2e", "b2e",
                   "wc1", "bc1", "wc2", "wcm", "bcm",
                   "w1n_x", "w1n_a", "w1n_c", "b1n", "w2n", "b2n")

    inputs = (node_feats, coords_pad, edge_attr_p, row, col) + tuple(p[k] for k in weight_keys)
    in_specs = ([full_spec(node_feats.shape), full_spec(coords_pad.shape),
                 etile_spec(Fe), etile_spec(1), etile_spec(1)]
                + [full_spec(p[k].shape) for k in weight_keys])

    out_w = out_nf + 3
    out_shape = (jax.ShapeDtypeStruct((e_pad, FeP), f32),   # edge_out (lane-padded)
                 jax.ShapeDtypeStruct((N, out_w), f32))     # [node_out | coord_out]
    out_specs = (etile_spec(FeP), full_spec((N, out_w)))

    scratch_shapes = [
        pltpu.VMEM((N, H), jnp.bfloat16),       # slab_i = bf16(x @ W1e_i)
        pltpu.VMEM((N, H), jnp.bfloat16),       # slab_j = bf16(x @ W1e_j)
        pltpu.VMEM((N, CP + FeP), f32),         # agg    = [agg_trans | agg_edge_out]
        pltpu.VMEM((tile_e, N), jnp.int32),     # hoisted iota
    ]

    # Explicit VMEM budget (v7x has only 64 MiB physical; v5e default scoped limit 16 MiB).
    budget = _vmem_budget_bytes(N, Fn, Fe, H, CP, FeP, tile_e, out_w,
                                [p[k] for k in weight_keys])
    vmem_limit = int(min(100 * 2**20, max(32 * 2**20, 2 * budget)))

    edge_out_p, nodecoord = pl.pallas_call(
        nec_kernel,
        grid=grid,
        in_specs=in_specs,
        out_specs=out_specs,
        out_shape=out_shape,
        scratch_shapes=scratch_shapes,
        # Edge axis is a reduction into the node-level accumulator/outputs.
        # TODO(synk): on v7x, split the edge axis over the 2 TensorCores with per-core
        #             agg scratch and a tiny merge (run_on_first_core) for ~2x.
        compiler_params=pltpu.CompilerParams(
            dimension_semantics=("arbitrary",),
            vmem_limit_bytes=vmem_limit),
    )(*inputs)

    edge_out = edge_out_p[:E, :Fe]
    node_out = nodecoord[:, :out_nf]
    coord_out = nodecoord[:, out_nf:]
    return node_out, edge_out, coord_out


# ---------------------------------------------------------------------------
# Parameters + pure-JAX reference (mirrors the PyTorch module)
# ---------------------------------------------------------------------------
def init_params(key, in_node_nf, in_edge_nf, h_nf, out_nf):
    """Deterministic synthetic parameters. Weights stored as [in, out]."""
    coord_dim = 3
    radial_dim = 1
    h_coord_nf = 2 * radial_dim
    ks = jax.random.split(key, 16)

    def w(k, shape, scale=0.1):
        return (scale * jax.random.normal(k, shape)).astype(jnp.float32)

    p = {}
    p["w1e_i"] = w(ks[0], (in_node_nf, h_nf))
    p["w1e_j"] = w(ks[1], (in_node_nf, h_nf))
    p["w1e_a"] = w(ks[2], (in_edge_nf, h_nf))
    p["w1e_r"] = w(ks[3], (radial_dim, h_nf))
    p["b1e"] = w(ks[4], (1, h_nf))
    p["w2e"] = w(ks[5], (h_nf, in_edge_nf))
    p["b2e"] = w(ks[6], (1, in_edge_nf))
    p["wc1"] = w(ks[7], (in_edge_nf, h_coord_nf))
    p["bc1"] = w(ks[8], (1, h_coord_nf))
    p["wc2"] = w(ks[9], (h_coord_nf, radial_dim), scale=1e-3)
    p["wcm"] = w(ks[10], (coord_dim, coord_dim))
    p["bcm"] = w(ks[11], (1, coord_dim))
    p["w1n_x"] = w(ks[12], (in_node_nf, h_nf))
    p["w1n_a"] = w(ks[13], (in_edge_nf, h_nf))
    p["w1n_c"] = w(ks[14], (coord_dim, h_nf))
    p["b1n"] = w(ks[15], (1, h_nf))
    k2 = jax.random.split(ks[15], 2)
    p["w2n"] = w(k2[0], (h_nf, out_nf))
    p["b2n"] = w(k2[1], (1, out_nf))
    return p


def reference_forward(node_feats, edge_index, edge_attr, coords, p):
    row, col = edge_index[0], edge_index[1]
    N = node_feats.shape[0]

    def seg_sum(data, idx, n):
        return jnp.zeros((n, data.shape[1]), data.dtype).at[idx].add(data)

    cd = coords[row] - coords[col]
    radial = jnp.sum(cd ** 2, axis=1, keepdims=True)
    ncd = cd / (jnp.sqrt(radial) + 1.0)

    edge_in_w1 = (node_feats[row] @ p["w1e_i"] + node_feats[col] @ p["w1e_j"]
                  + edge_attr @ p["w1e_a"] + radial @ p["w1e_r"] + p["b1e"])
    edge_out = jnp.maximum(edge_in_w1, 0.0) @ p["w2e"] + p["b2e"]

    e_c = jnp.maximum(edge_out @ p["wc1"] + p["bc1"], 0.0) @ p["wc2"]
    coords_new = coords + seg_sum(ncd * e_c, row, N)
    coord_out = coords_new @ p["wcm"] + p["bcm"]

    agg = seg_sum(edge_out, row, N)
    h_n = jnp.maximum(node_feats @ p["w1n_x"] + agg @ p["w1n_a"]
                      + coord_out @ p["w1n_c"] + p["b1n"], 0.0)
    node_out = h_n @ p["w2n"] + p["b2n"]
    return node_out, edge_out, coord_out


if __name__ == "__main__":
    key = jax.random.PRNGKey(0)
    k_nf, k_ea, k_c, k_ei, k_p = jax.random.split(key, 5)

    # Small shapes; E=40 with tile_e=16 exercises init, multi-step accumulation and the
    # padded-edge masking path (8 padding edges).
    N, E = 8, 40
    in_node_nf, in_edge_nf, h_nf, out_nf = 8, 4, 32, 8

    node_feats = jax.random.normal(k_nf, (N, in_node_nf), dtype=jnp.float32)
    edge_attr = jax.random.normal(k_ea, (E, in_edge_nf), dtype=jnp.float32)
    coords = jax.random.normal(k_c, (N, 3), dtype=jnp.float32)
    edge_index = jax.random.randint(k_ei, (2, E), 0, N, dtype=jnp.int32)

    params = init_params(k_p, in_node_nf, in_edge_nf, h_nf, out_nf)

    node_out, edge_out, coord_out = node_edge_coord_forward(
        node_feats, edge_index, edge_attr, coords, params, tile_e=16)
    jax.block_until_ready((node_out, edge_out, coord_out))

    ref = reference_forward(node_feats, edge_index, edge_attr, coords, params)
    np.testing.assert_allclose(np.asarray(node_out), np.asarray(ref[0]), rtol=5e-3, atol=5e-3)
    np.testing.assert_allclose(np.asarray(edge_out), np.asarray(ref[1]), rtol=5e-3, atol=5e-3)
    np.testing.assert_allclose(np.asarray(coord_out), np.asarray(ref[2]), rtol=5e-3, atol=5e-3)

    print("KERNEL_OK")
</pallas_src>

<mosaic_0001>
module attributes {stable_mosaic.version = 11 : i64} {
  func.func @nec_kernel(%arg0: i32, %arg1: memref<8x8xf32, #tpu.memory_space<vmem>>, %arg2: memref<8x128xf32, #tpu.memory_space<vmem>>, %arg3: memref<16x4xf32, #tpu.memory_space<vmem>>, %arg4: memref<16x1xi32, #tpu.memory_space<vmem>>, %arg5: memref<16x1xi32, #tpu.memory_space<vmem>>, %arg6: memref<8x128xf32, #tpu.memory_space<vmem>>, %arg7: memref<8x128xf32, #tpu.memory_space<vmem>>, %arg8: memref<4x128xf32, #tpu.memory_space<vmem>>, %arg9: memref<1x128xf32, #tpu.memory_space<vmem>>, %arg10: memref<1x128xf32, #tpu.memory_space<vmem>>, %arg11: memref<128x128xf32, #tpu.memory_space<vmem>>, %arg12: memref<1x128xf32, #tpu.memory_space<vmem>>, %arg13: memref<128x128xf32, #tpu.memory_space<vmem>>, %arg14: memref<1x128xf32, #tpu.memory_space<vmem>>, %arg15: memref<2x1xf32, #tpu.memory_space<vmem>>, %arg16: memref<3x3xf32, #tpu.memory_space<vmem>>, %arg17: memref<1x3xf32, #tpu.memory_space<vmem>>, %arg18: memref<8x128xf32, #tpu.memory_space<vmem>>, %arg19: memref<128x128xf32, #tpu.memory_space<vmem>>, %arg20: memref<3x128xf32, #tpu.memory_space<vmem>>, %arg21: memref<1x128xf32, #tpu.memory_space<vmem>>, %arg22: memref<128x8xf32, #tpu.memory_space<vmem>>, %arg23: memref<1x8xf32, #tpu.memory_space<vmem>>, %arg24: memref<16x128xf32, #tpu.memory_space<vmem>>, %arg25: memref<8x11xf32, #tpu.memory_space<vmem>>, %arg26: memref<8x128xbf16, #tpu.memory_space<vmem>>, %arg27: memref<8x128xbf16, #tpu.memory_space<vmem>>, %arg28: memref<8x256xf32, #tpu.memory_space<vmem>>, %arg29: memref<16x8xi32, #tpu.memory_space<vmem>>) attributes {dimension_semantics = [#tpu.dimension_semantics<arbitrary>], iteration_bounds = array<i64: 3>, scalar_prefetch = 0 : i64, scratch_operands = 4 : i64, tpu.core_type = #tpu.core_type<tc>, window_params = [{pipeline_mode = #tpu.pipeline_mode<synchronous>, transform_indices = @transform_0, window_bounds = array<i64: 8, 8>}, {pipeline_mode = #tpu.pipeline_mode<synchronous>, transform_indices = @transform_1, window_bounds = array<i64: 8, 128>}, {transform_indices = @transform_2, window_bounds = array<i64: 16, 4>}, {transform_indices = @transform_3, window_bounds = array<i64: 16, 1>}, {transform_indices = @transform_4, window_bounds = array<i64: 16, 1>}, {pipeline_mode = #tpu.pipeline_mode<synchronous>, transform_indices = @transform_5, window_bounds = array<i64: 8, 128>}, {pipeline_mode = #tpu.pipeline_mode<synchronous>, transform_indices = @transform_6, window_bounds = array<i64: 8, 128>}, {pipeline_mode = #tpu.pipeline_mode<synchronous>, transform_indices = @transform_7, window_bounds = array<i64: 4, 128>}, {pipeline_mode = #tpu.pipeline_mode<synchronous>, transform_indices = @transform_8, window_bounds = array<i64: 1, 128>}, {pipeline_mode = #tpu.pipeline_mode<synchronous>, transform_indices = @transform_9, window_bounds = array<i64: 1, 128>}, {pipeline_mode = #tpu.pipeline_mode<synchronous>, transform_indices = @transform_10, window_bounds = array<i64: 128, 128>}, {pipeline_mode = #tpu.pipeline_mode<synchronous>, transform_indices = @transform_11, window_bounds = array<i64: 1, 128>}, {pipeline_mode = #tpu.pipeline_mode<synchronous>, transform_indices = @transform_12, window_bounds = array<i64: 128, 128>}, {pipeline_mode = #tpu.pipeline_mode<synchronous>, transform_indices = @transform_13, window_bounds = array<i64: 1, 128>}, {pipeline_mode = #tpu.pipeline_mode<synchronous>, transform_indices = @transform_14, window_bounds = array<i64: 2, 1>}, {pipeline_mode = #tpu.pipeline_mode<synchronous>, transform_indices = @transform_15, window_bounds = array<i64: 3, 3>}, {pipeline_mode = #tpu.pipeline_mode<synchronous>, transform_indices = @transform_16, window_bounds = array<i64: 1, 3>}, {pipeline_mode = #tpu.pipeline_mode<synchronous>, transform_indices = @transform_17, window_bounds = array<i64: 8, 128>}, {pipeline_mode = #tpu.pipeline_mode<synchronous>, transform_indices = @transform_18, window_bounds = array<i64: 128, 128>}, {pipeline_mode = #tpu.pipeline_mode<synchronous>, transform_indices = @transform_19, window_bounds = array<i64: 3, 128>}, {pipeline_mode = #tpu.pipeline_mode<synchronous>, transform_indices = @transform_20, window_bounds = array<i64: 1, 128>}, {pipeline_mode = #tpu.pipeline_mode<synchronous>, transform_indices = @transform_21, window_bounds = array<i64: 128, 8>}, {pipeline_mode = #tpu.pipeline_mode<synchronous>, transform_indices = @transform_22, window_bounds = array<i64: 1, 8>}, {transform_indices = @transform_23, window_bounds = array<i64: 16, 128>}, {pipeline_mode = #tpu.pipeline_mode<synchronous>, transform_indices = @transform_24, window_bounds = array<i64: 8, 11>}]} {
    %c0_i32 = arith.constant 0 : i32
    %0 = arith.cmpi eq, %arg0, %c0_i32 : i32
    %1 = arith.extui %0 : i1 to i32
    %c0_i32_0 = arith.constant 0 : i32
    %2 = arith.cmpi ne, %1, %c0_i32_0 : i32
    scf.if %2 {
      %c0_47 = arith.constant 0 : index
      %c0_48 = arith.constant 0 : index
      %79 = vector.load %arg1[%c0_47, %c0_48] : memref<8x8xf32, #tpu.memory_space<vmem>>, vector<8x8xf32>
      %c0_49 = arith.constant 0 : index
      %c0_50 = arith.constant 0 : index
      %80 = vector.load %arg6[%c0_49, %c0_50] : memref<8x128xf32, #tpu.memory_space<vmem>>, vector<8x128xf32>
      %cst_51 = arith.constant dense<0.000000e+00> : vector<8x128xf32>
      %81 = tpu.matmul %79, %80, %cst_51 {dimension_numbers = #tpu.dot_dimension_numbers<[1], [0], [0], [1], [0, 0, 1, 1], [], []>} : vector<8x8xf32>, vector<8x128xf32>, vector<8x128xf32> -> vector<8x128xf32>
      %82 = arith.truncf %81 : vector<8x128xf32> to vector<8x128xbf16>
      %c0_52 = arith.constant 0 : index
      %c0_53 = arith.constant 0 : index
      %83 = vector.load %arg26[%c0_52, %c0_53] : memref<8x128xbf16, #tpu.memory_space<vmem>>, vector<8x128xbf16>
      tpu.vector_store %arg26[%c0_52, %c0_53], %82 {strides = array<i32>} : memref<8x128xbf16, #tpu.memory_space<vmem>>, vector<8x128xbf16>,
      %c0_54 = arith.constant 0 : index
      %c0_55 = arith.constant 0 : index
      %84 = vector.load %arg7[%c0_54, %c0_55] : memref<8x128xf32, #tpu.memory_space<vmem>>, vector<8x128xf32>
      %cst_56 = arith.constant dense<0.000000e+00> : vector<8x128xf32>
      %85 = tpu.matmul %79, %84, %cst_56 {dimension_numbers = #tpu.dot_dimension_numbers<[1], [0], [0], [1], [0, 0, 1, 1], [], []>} : vector<8x8xf32>, vector<8x128xf32>, vector<8x128xf32> -> vector<8x128xf32>
      %86 = arith.truncf %85 : vector<8x128xf32> to vector<8x128xbf16>
      %c0_57 = arith.constant 0 : index
      %c0_58 = arith.constant 0 : index
      %87 = vector.load %arg27[%c0_57, %c0_58] : memref<8x128xbf16, #tpu.memory_space<vmem>>, vector<8x128xbf16>
      tpu.vector_store %arg27[%c0_57, %c0_58], %86 {strides = array<i32>} : memref<8x128xbf16, #tpu.memory_space<vmem>>, vector<8x128xbf16>,
      %cst_59 = arith.constant 0.000000e+00 : f32
      %88 = vector.broadcast %cst_59 : f32 to vector<8x256xf32>
      %c0_60 = arith.constant 0 : index
      %c0_61 = arith.constant 0 : index
      %89 = vector.load %arg28[%c0_60, %c0_61] : memref<8x256xf32, #tpu.memory_space<vmem>>, vector<8x256xf32>
      tpu.vector_store %arg28[%c0_60, %c0_61], %88 {strides = array<i32>} : memref<8x256xf32, #tpu.memory_space<vmem>>, vector<8x256xf32>,
      %90 = tpu.iota {dimensions = array<i32: 1>} : vector<16x8xi32>
      %c0_62 = arith.constant 0 : index
      %c0_63 = arith.constant 0 : index
      %91 = vector.load %arg29[%c0_62, %c0_63] : memref<16x8xi32, #tpu.memory_space<vmem>>, vector<16x8xi32>
      tpu.vector_store %arg29[%c0_62, %c0_63], %90 {strides = array<i32>} : memref<16x8xi32, #tpu.memory_space<vmem>>, vector<16x8xi32>,
    } else {
    }
    %c0 = arith.constant 0 : index
    %c0_1 = arith.constant 0 : index
    %3 = vector.load %arg4[%c0, %c0_1] : memref<16x1xi32, #tpu.memory_space<vmem>>, vector<16x1xi32>
    %c0_2 = arith.constant 0 : index
    %c0_3 = arith.constant 0 : index
    %4 = vector.load %arg5[%c0_2, %c0_3] : memref<16x1xi32, #tpu.memory_space<vmem>>, vector<16x1xi32>
    %c0_4 = arith.constant 0 : index
    %c0_5 = arith.constant 0 : index
    %5 = vector.load %arg3[%c0_4, %c0_5] : memref<16x4xf32, #tpu.memory_space<vmem>>, vector<16x4xf32>
    %c0_6 = arith.constant 0 : index
    %c0_7 = arith.constant 0 : index
    %6 = vector.load %arg29[%c0_6, %c0_7] : memref<16x8xi32, #tpu.memory_space<vmem>>, vector<16x8xi32>
    %7 = vector.broadcast %3 : vector<16x1xi32> to vector<16x8xi32>
    %8 = arith.cmpi eq, %6, %7 : vector<16x8xi32>
    %9 = arith.extui %8 : vector<16x8xi1> to vector<16x8xi32>
    %10 = arith.sitofp %9 : vector<16x8xi32> to vector<16x8xf32>
    %11 = vector.broadcast %4 : vector<16x1xi32> to vector<16x8xi32>
    %12 = arith.cmpi eq, %6, %11 : vector<16x8xi32>
    %13 = arith.extui %12 : vector<16x8xi1> to vector<16x8xi32>
    %14 = arith.sitofp %13 : vector<16x8xi32> to vector<16x8xf32>
    %15 = arith.truncf %10 : vector<16x8xf32> to vector<16x8xbf16>
    %16 = arith.truncf %14 : vector<16x8xf32> to vector<16x8xbf16>
    %c0_8 = arith.constant 0 : index
    %c0_9 = arith.constant 0 : index
    %17 = vector.load %arg26[%c0_8, %c0_9] : memref<8x128xbf16, #tpu.memory_space<vmem>>, vector<8x128xbf16>
    %cst = arith.constant dense<0.000000e+00> : vector<16x128xf32>
    %18 = tpu.matmul %15, %17, %cst {dimension_numbers = #tpu.dot_dimension_numbers<[1], [0], [0], [1], [0, 0, 1, 1], [], []>} : vector<16x8xbf16>, vector<8x128xbf16>, vector<16x128xf32> -> vector<16x128xf32>
    %c0_10 = arith.constant 0 : index
    %c0_11 = arith.constant 0 : index
    %19 = vector.load %arg27[%c0_10, %c0_11] : memref<8x128xbf16, #tpu.memory_space<vmem>>, vector<8x128xbf16>
    %cst_12 = arith.constant dense<0.000000e+00> : vector<16x128xf32>
    %20 = tpu.matmul %16, %19, %cst_12 {dimension_numbers = #tpu.dot_dimension_numbers<[1], [0], [0], [1], [0, 0, 1, 1], [], []>} : vector<16x8xbf16>, vector<8x128xbf16>, vector<16x128xf32> -> vector<16x128xf32>
    %21 = arith.subf %10, %14 : vector<16x8xf32>
    %c0_13 = arith.constant 0 : index
    %c0_14 = arith.constant 0 : index
    %22 = vector.load %arg2[%c0_13, %c0_14] : memref<8x128xf32, #tpu.memory_space<vmem>>, vector<8x128xf32>
    %cst_15 = arith.constant dense<0.000000e+00> : vector<16x128xf32>
    %23 = tpu.matmul %21, %22, %cst_15 {dimension_numbers = #tpu.dot_dimension_numbers<[1], [0], [0], [1], [0, 0, 1, 1], [], []>} : vector<16x8xf32>, vector<8x128xf32>, vector<16x128xf32> -> vector<16x128xf32>
    %24 = arith.mulf %23, %23 : vector<16x128xf32>
    %cst_16 = arith.constant dense<0.000000e+00> : vector<16xf32>
    %25 = vector.multi_reduction <add>, %24, %cst_16 [1] : vector<16x128xf32> to vector<16xf32>
    %26 = vector.shape_cast %25 : vector<16xf32> to vector<16x1xf32>
    %27 = math.sqrt %26 : vector<16x1xf32>
    %cst_17 = arith.constant 1.000000e+00 : f32
    %28 = vector.broadcast %cst_17 : f32 to vector<16x1xf32>
    %29 = arith.addf %27, %28 : vector<16x1xf32>
    %30 = vector.broadcast %29 : vector<16x1xf32> to vector<16x128xf32>
    %31 = arith.divf %23, %30 : vector<16x128xf32>
    %32 = arith.addf %18, %20 : vector<16x128xf32>
    %c0_18 = arith.constant 0 : index
    %c0_19 = arith.constant 0 : index
    %33 = vector.load %arg8[%c0_18, %c0_19] : memref<4x128xf32, #tpu.memory_space<vmem>>, vector<4x128xf32>
    %cst_20 = arith.constant dense<0.000000e+00> : vector<16x128xf32>
    %34 = tpu.matmul %5, %33, %cst_20 {dimension_numbers = #tpu.dot_dimension_numbers<[1], [0], [0], [1], [0, 0, 1, 1], [], []>} : vector<16x4xf32>, vector<4x128xf32>, vector<16x128xf32> -> vector<16x128xf32>
    %35 = arith.addf %32, %34 : vector<16x128xf32>
    %c0_21 = arith.constant 0 : index
    %c0_22 = arith.constant 0 : index
    %36 = vector.load %arg9[%c0_21, %c0_22] : memref<1x128xf32, #tpu.memory_space<vmem>>, vector<1x128xf32>
    %37 = vector.broadcast %26 : vector<16x1xf32> to vector<16x128xf32>
    %38 = vector.broadcast %36 : vector<1x128xf32> to vector<16x128xf32>
    %39 = arith.mulf %37, %38 : vector<16x128xf32>
    %40 = arith.addf %35, %39 : vector<16x128xf32>
    %c0_23 = arith.constant 0 : index
    %c0_24 = arith.constant 0 : index
    %41 = vector.load %arg10[%c0_23, %c0_24] : memref<1x128xf32, #tpu.memory_space<vmem>>, vector<1x128xf32>
    %42 = vector.broadcast %41 : vector<1x128xf32> to vector<16x128xf32>
    %43 = arith.addf %40, %42 : vector<16x128xf32>
    %cst_25 = arith.constant 0.000000e+00 : f32
    %44 = vector.broadcast %cst_25 : f32 to vector<16x128xf32>
    %45 = arith.maximumf %43, %44 : vector<16x128xf32>
    %c0_26 = arith.constant 0 : index
    %c0_27 = arith.constant 0 : index
    %46 = vector.load %arg11[%c0_26, %c0_27] : memref<128x128xf32, #tpu.memory_space<vmem>>, vector<128x128xf32>
    %cst_28 = arith.constant dense<0.000000e+00> : vector<16x128xf32>
    %47 = tpu.matmul %45, %46, %cst_28 {dimension_numbers = #tpu.dot_dimension_numbers<[1], [0], [0], [1], [0, 0, 1, 1], [], []>} : vector<16x128xf32>, vector<128x128xf32>, vector<16x128xf32> -> vector<16x128xf32>
    %c0_29 = arith.constant 0 : index
    %c0_30 = arith.constant 0 : index
    %48 = vector.load %arg12[%c0_29, %c0_30] : memref<1x128xf32, #tpu.memory_space<vmem>>, vector<1x128xf32>
    %49 = vector.broadcast %48 : vector<1x128xf32> to vector<16x128xf32>
    %50 = arith.addf %47, %49 : vector<16x128xf32>
    %c0_31 = arith.constant 0 : index
    %c0_32 = arith.constant 0 : index
    %51 = vector.load %arg24[%c0_31, %c0_32] : memref<16x128xf32, #tpu.memory_space<vmem>>, vector<16x128xf32>
    tpu.vector_store %arg24[%c0_31, %c0_32], %50 {strides = array<i32>} : memref<16x128xf32, #tpu.memory_space<vmem>>, vector<16x128xf32>,
    %c0_33 = arith.constant 0 : index
    %c0_34 = arith.constant 0 : index
    %52 = vector.load %arg13[%c0_33, %c0_34] : memref<128x128xf32, #tpu.memory_space<vmem>>, vector<128x128xf32>
    %cst_35 = arith.constant dense<0.000000e+00> : vector<16x128xf32>
    %53 = tpu.matmul %50, %52, %cst_35 {dimension_numbers = #tpu.dot_dimension_numbers<[1], [0], [0], [1], [0, 0, 1, 1], [], []>} : vector<16x128xf32>, vector<128x128xf32>, vector<16x128xf32> -> vector<16x128xf32>
    %c0_36 = arith.constant 0 : index
    %c0_37 = arith.constant 0 : index
    %54 = vector.load %arg14[%c0_36, %c0_37] : memref<1x128xf32, #tpu.memory_space<vmem>>, vector<1x128xf32>
    %55 = vector.broadcast %54 : vector<1x128xf32> to vector<16x128xf32>
    %56 = arith.addf %53, %55 : vector<16x128xf32>
    %cst_38 = arith.constant 0.000000e+00 : f32
    %57 = vector.broadcast %cst_38 : f32 to vector<16x128xf32>
    %58 = arith.maximumf %56, %57 : vector<16x128xf32>
    %c0_39 = arith.constant 0 : index
    %c0_40 = arith.constant 0 : index
    %59 = vector.load %arg15[%c0_39, %c0_40] : memref<2x1xf32, #tpu.memory_space<vmem>>, vector<2x1xf32>
    %60 = vector.extract_strided_slice %58 {offsets = [0, 0], sizes = [16, 1], strides = [1, 1]} : vector<16x128xf32> to vector<16x1xf32>
    %61 = vector.extract_strided_slice %59 {offsets = [0, 0], sizes = [1, 1], strides = [1, 1]} : vector<2x1xf32> to vector<1x1xf32>
    %62 = vector.broadcast %61 : vector<1x1xf32> to vector<16x1xf32>
    %63 = arith.mulf %60, %62 : vector<16x1xf32>
    %64 = vector.extract_strided_slice %58 {offsets = [0, 1], sizes = [16, 1], strides = [1, 1]} : vector<16x128xf32> to vector<16x1xf32>
    %65 = vector.extract_strided_slice %59 {offsets = [1, 0], sizes = [1, 1], strides = [1, 1]} : vector<2x1xf32> to vector<1x1xf32>
    %66 = vector.broadcast %65 : vector<1x1xf32> to vector<16x1xf32>
    %67 = arith.mulf %64, %66 : vector<16x1xf32>
    %68 = arith.addf %63, %67 : vector<16x1xf32>
    %69 = vector.broadcast %68 : vector<16x1xf32> to vector<16x128xf32>
    %70 = arith.mulf %31, %69 : vector<16x128xf32>
    %71 = tpu.concatenate %70, %50 in 1 : vector<16x128xf32>, vector<16x128xf32> -> vector<16x256xf32>
    %c0_41 = arith.constant 0 : index
    %c0_42 = arith.constant 0 : index
    %72 = vector.load %arg28[%c0_41, %c0_42] : memref<8x256xf32, #tpu.memory_space<vmem>>, vector<8x256xf32>
    %cst_43 = arith.constant dense<0.000000e+00> : vector<8x256xf32>
    %73 = tpu.matmul %10, %71, %cst_43 {dimension_numbers = #tpu.dot_dimension_numbers<[0], [0], [1], [1], [0, 1, 1, 1], [], []>} : vector<16x8xf32>, vector<16x256xf32>, vector<8x256xf32> -> vector<8x256xf32>
    %74 = arith.addf %72, %73 : vector<8x256xf32>
    %c0_44 = arith.constant 0 : index
    %c0_45 = arith.constant 0 : index
    %75 = vector.load %arg28[%c0_44, %c0_45] : memref<8x256xf32, #tpu.memory_space<vmem>>, vector<8x256xf32>
    tpu.vector_store %arg28[%c0_44, %c0_45], %74 {strides = array<i32>} : memref<8x256xf32, #tpu.memory_space<vmem>>, vector<8x256xf32>,
    %c2_i32 = arith.constant 2 : i32
    %76 = arith.cmpi eq, %arg0, %c2_i32 : i32
    %77 = arith.extui %76 : i1 to i32
    %c0_i32_46 = arith.constant 0 : i32
    %78 = arith.cmpi ne, %77, %c0_i32_46 : i32
    scf.if %78 {
      %c0_47 = arith.constant 0 : index
      %c0_48 = arith.constant 0 : index
      %79 = vector.load %arg1[%c0_47, %c0_48] : memref<8x8xf32, #tpu.memory_space<vmem>>, vector<8x8xf32>
      %c0_49 = arith.constant 0 : index
      %c0_50 = arith.constant 0 : index
      %80 = vector.load %arg28[%c0_49, %c0_50] : memref<8x256xf32, #tpu.memory_space<vmem>>, vector<8x256xf32>
      %c0_51 = arith.constant 0 : index
      %c0_52 = arith.constant 0 : index
      %81 = vector.load %arg2[%c0_51, %c0_52] : memref<8x128xf32, #tpu.memory_space<vmem>>, vector<8x128xf32>
      %82 = vector.extract_strided_slice %81 {offsets = [0, 0], sizes = [8, 3], strides = [1, 1]} : vector<8x128xf32> to vector<8x3xf32>
      %83 = vector.extract_strided_slice %80 {offsets = [0, 0], sizes = [8, 3], strides = [1, 1]} : vector<8x256xf32> to vector<8x3xf32>
      %84 = arith.addf %82, %83 : vector<8x3xf32>
      %c0_53 = arith.constant 0 : index
      %c0_54 = arith.constant 0 : index
      %85 = vector.load %arg16[%c0_53, %c0_54] : memref<3x3xf32, #tpu.memory_space<vmem>>, vector<3x3xf32>
      %cst_55 = arith.constant dense<0.000000e+00> : vector<8x3xf32>
      %86 = tpu.matmul %84, %85, %cst_55 {dimension_numbers = #tpu.dot_dimension_numbers<[1], [0], [0], [1], [0, 0, 1, 1], [], []>} : vector<8x3xf32>, vector<3x3xf32>, vector<8x3xf32> -> vector<8x3xf32>
      %c0_56 = arith.constant 0 : index
      %c0_57 = arith.constant 0 : index
      %87 = vector.load %arg17[%c0_56, %c0_57] : memref<1x3xf32, #tpu.memory_space<vmem>>, vector<1x3xf32>
      %88 = vector.broadcast %87 : vector<1x3xf32> to vector<8x3xf32>
      %89 = arith.addf %86, %88 : vector<8x3xf32>
      %90 = vector.extract_strided_slice %80 {offsets = [0, 128], sizes = [8, 128], strides = [1, 1]} : vector<8x256xf32> to vector<8x128xf32>
      %c0_58 = arith.constant 0 : index
      %c0_59 = arith.constant 0 : index
      %91 = vector.load %arg18[%c0_58, %c0_59] : memref<8x128xf32, #tpu.memory_space<vmem>>, vector<8x128xf32>
      %cst_60 = arith.constant dense<0.000000e+00> : vector<8x128xf32>
      %92 = tpu.matmul %79, %91, %cst_60 {dimension_numbers = #tpu.dot_dimension_numbers<[1], [0], [0], [1], [0, 0, 1, 1], [], []>} : vector<8x8xf32>, vector<8x128xf32>, vector<8x128xf32> -> vector<8x128xf32>
      %c0_61 = arith.constant 0 : index
      %c0_62 = arith.constant 0 : index
      %93 = vector.load %arg19[%c0_61, %c0_62] : memref<128x128xf32, #tpu.memory_space<vmem>>, vector<128x128xf32>
      %cst_63 = arith.constant dense<0.000000e+00> : vector<8x128xf32>
      %94 = tpu.matmul %90, %93, %cst_63 {dimension_numbers = #tpu.dot_dimension_numbers<[1], [0], [0], [1], [0, 0, 1, 1], [], []>} : vector<8x128xf32>, vector<128x128xf32>, vector<8x128xf32> -> vector<8x128xf32>
      %95 = arith.addf %92, %94 : vector<8x128xf32>
      %c0_64 = arith.constant 0 : index
      %c0_65 = arith.constant 0 : index
      %96 = vector.load %arg20[%c0_64, %c0_65] : memref<3x128xf32, #tpu.memory_space<vmem>>, vector<3x128xf32>
      %cst_66 = arith.constant dense<0.000000e+00> : vector<8x128xf32>
      %97 = tpu.matmul %89, %96, %cst_66 {dimension_numbers = #tpu.dot_dimension_numbers<[1], [0], [0], [1], [0, 0, 1, 1], [], []>} : vector<8x3xf32>, vector<3x128xf32>, vector<8x128xf32> -> vector<8x128xf32>
      %98 = arith.addf %95, %97 : vector<8x128xf32>
      %c0_67 = arith.constant 0 : index
      %c0_68 = arith.constant 0 : index
      %99 = vector.load %arg21[%c0_67, %c0_68] : memref<1x128xf32, #tpu.memory_space<vmem>>, vector<1x128xf32>
      %100 = vector.broadcast %99 : vector<1x128xf32> to vector<8x128xf32>
      %101 = arith.addf %98, %100 : vector<8x128xf32>
      %cst_69 = arith.constant 0.000000e+00 : f32
      %102 = vector.broadcast %cst_69 : f32 to vector<8x128xf32>
      %103 = arith.maximumf %101, %102 : vector<8x128xf32>
      %c0_70 = arith.constant 0 : index
      %c0_71 = arith.constant 0 : index
      %104 = vector.load %arg22[%c0_70, %c0_71] : memref<128x8xf32, #tpu.memory_space<vmem>>, vector<128x8xf32>
      %cst_72 = arith.constant dense<0.000000e+00> : vector<8x8xf32>
      %105 = tpu.matmul %103, %104, %cst_72 {dimension_numbers = #tpu.dot_dimension_numbers<[1], [0], [0], [1], [0, 0, 1, 1], [], []>} : vector<8x128xf32>, vector<128x8xf32>, vector<8x8xf32> -> vector<8x8xf32>
      %c0_73 = arith.constant 0 : index
      %c0_74 = arith.constant 0 : index
      %106 = vector.load %arg23[%c0_73, %c0_74] : memref<1x8xf32, #tpu.memory_space<vmem>>, vector<1x8xf32>
      %107 = vector.broadcast %106 : vector<1x8xf32> to vector<8x8xf32>
      %108 = arith.addf %105, %107 : vector<8x8xf32>
      %109 = tpu.concatenate %108, %89 in 1 : vector<8x8xf32>, vector<8x3xf32> -> vector<8x11xf32>
      %c0_75 = arith.constant 0 : index
      %c0_76 = arith.constant 0 : index
      %110 = vector.load %arg25[%c0_75, %c0_76] : memref<8x11xf32, #tpu.memory_space<vmem>>, vector<8x11xf32>
      tpu.vector_store %arg25[%c0_75, %c0_76], %109 {strides = array<i32>} : memref<8x11xf32, #tpu.memory_space<vmem>>, vector<8x11xf32>,
    } else {
    }
    return
  }
  func.func @transform_0(%arg0: i32) -> (i32, i32) {
    %c0_i32 = arith.constant 0 : i32
    %c0_i32_0 = arith.constant 0 : i32
    %c0_i32_1 = arith.constant 0 : i32
    return %c0_i32, %c0_i32_0 : i32, i32
  }
  func.func @transform_1(%arg0: i32) -> (i32, i32) {
    %c0_i32 = arith.constant 0 : i32
    %c0_i32_0 = arith.constant 0 : i32
    %c0_i32_1 = arith.constant 0 : i32
    return %c0_i32, %c0_i32_0 : i32, i32
  }
  func.func @transform_2(%arg0: i32) -> (i32, i32) {
    %c0_i32 = arith.constant 0 : i32
    %c0_i32_0 = arith.constant 0 : i32
    return %arg0, %c0_i32 : i32, i32
  }
  func.func @transform_3(%arg0: i32) -> (i32, i32) {
    %c0_i32 = arith.constant 0 : i32
    %c0_i32_0 = arith.constant 0 : i32
    return %arg0, %c0_i32 : i32, i32
  }
  func.func @transform_4(%arg0: i32) -> (i32, i32) {
    %c0_i32 = arith.constant 0 : i32
    %c0_i32_0 = arith.constant 0 : i32
    return %arg0, %c0_i32 : i32, i32
  }
  func.func @transform_5(%arg0: i32) -> (i32, i32) {
    %c0_i32 = arith.constant 0 : i32
    %c0_i32_0 = arith.constant 0 : i32
    %c0_i32_1 = arith.constant 0 : i32
    return %c0_i32, %c0_i32_0 : i32, i32
  }
  func.func @transform_6(%arg0: i32) -> (i32, i32) {
    %c0_i32 = arith.constant 0 : i32
    %c0_i32_0 = arith.constant 0 : i32
    %c0_i32_1 = arith.constant 0 : i32
    return %c0_i32, %c0_i32_0 : i32, i32
  }
  func.func @transform_7(%arg0: i32) -> (i32, i32) {
    %c0_i32 = arith.constant 0 : i32
    %c0_i32_0 = arith.constant 0 : i32
    %c0_i32_1 = arith.constant 0 : i32
    return %c0_i32, %c0_i32_0 : i32, i32
  }
  func.func @transform_8(%arg0: i32) -> (i32, i32) {
    %c0_i32 = arith.constant 0 : i32
    %c0_i32_0 = arith.constant 0 : i32
    %c0_i32_1 = arith.constant 0 : i32
    return %c0_i32, %c0_i32_0 : i32, i32
  }
  func.func @transform_9(%arg0: i32) -> (i32, i32) {
    %c0_i32 = arith.constant 0 : i32
    %c0_i32_0 = arith.constant 0 : i32
    %c0_i32_1 = arith.constant 0 : i32
    return %c0_i32, %c0_i32_0 : i32, i32
  }
  func.func @transform_10(%arg0: i32) -> (i32, i32) {
    %c0_i32 = arith.constant 0 : i32
    %c0_i32_0 = arith.constant 0 : i32
    %c0_i32_1 = arith.constant 0 : i32
    return %c0_i32, %c0_i32_0 : i32, i32
  }
  func.func @transform_11(%arg0: i32) -> (i32, i32) {
    %c0_i32 = arith.constant 0 : i32
    %c0_i32_0 = arith.constant 0 : i32
    %c0_i32_1 = arith.constant 0 : i32
    return %c0_i32, %c0_i32_0 : i32, i32
  }
  func.func @transform_12(%arg0: i32) -> (i32, i32) {
    %c0_i32 = arith.constant 0 : i32
    %c0_i32_0 = arith.constant 0 : i32
    %c0_i32_1 = arith.constant 0 : i32
    return %c0_i32, %c0_i32_0 : i32, i32
  }
  func.func @transform_13(%arg0: i32) -> (i32, i32) {
    %c0_i32 = arith.constant 0 : i32
    %c0_i32_0 = arith.constant 0 : i32
    %c0_i32_1 = arith.constant 0 : i32
    return %c0_i32, %c0_i32_0 : i32, i32
  }
  func.func @transform_14(%arg0: i32) -> (i32, i32) {
    %c0_i32 = arith.constant 0 : i32
    %c0_i32_0 = arith.constant 0 : i32
    %c0_i32_1 = arith.constant 0 : i32
    return %c0_i32, %c0_i32_0 : i32, i32
  }
  func.func @transform_15(%arg0: i32) -> (i32, i32) {
    %c0_i32 = arith.constant 0 : i32
    %c0_i32_0 = arith.constant 0 : i32
    %c0_i32_1 = arith.constant 0 : i32
    return %c0_i32, %c0_i32_0 : i32, i32
  }
  func.func @transform_16(%arg0: i32) -> (i32, i32) {
    %c0_i32 = arith.constant 0 : i32
    %c0_i32_0 = arith.constant 0 : i32
    %c0_i32_1 = arith.constant 0 : i32
    return %c0_i32, %c0_i32_0 : i32, i32
  }
  func.func @transform_17(%arg0: i32) -> (i32, i32) {
    %c0_i32 = arith.constant 0 : i32
    %c0_i32_0 = arith.constant 0 : i32
    %c0_i32_1 = arith.constant 0 : i32
    return %c0_i32, %c0_i32_0 : i32, i32
  }
  func.func @transform_18(%arg0: i32) -> (i32, i32) {
    %c0_i32 = arith.constant 0 : i32
    %c0_i32_0 = arith.constant 0 : i32
    %c0_i32_1 = arith.constant 0 : i32
    return %c0_i32, %c0_i32_0 : i32, i32
  }
  func.func @transform_19(%arg0: i32) -> (i32, i32) {
    %c0_i32 = arith.constant 0 : i32
    %c0_i32_0 = arith.constant 0 : i32
    %c0_i32_1 = arith.constant 0 : i32
    return %c0_i32, %c0_i32_0 : i32, i32
  }
  func.func @transform_20(%arg0: i32) -> (i32, i32) {
    %c0_i32 = arith.constant 0 : i32
    %c0_i32_0 = arith.constant 0 : i32
    %c0_i32_1 = arith.constant 0 : i32
    return %c0_i32, %c0_i32_0 : i32, i32
  }
  func.func @transform_21(%arg0: i32) -> (i32, i32) {
    %c0_i32 = arith.constant 0 : i32
    %c0_i32_0 = arith.constant 0 : i32
    %c0_i32_1 = arith.constant 0 : i32
    return %c0_i32, %c0_i32_0 : i32, i32
  }
  func.func @transform_22(%arg0: i32) -> (i32, i32) {
    %c0_i32 = arith.constant 0 : i32
    %c0_i32_0 = arith.constant 0 : i32
    %c0_i32_1 = arith.constant 0 : i32
    return %c0_i32, %c0_i32_0 : i32, i32
  }
  func.func @transform_23(%arg0: i32) -> (i32, i32) {
    %c0_i32 = arith.constant 0 : i32
    %c0_i32_0 = arith.constant 0 : i32
    return %arg0, %c0_i32 : i32, i32
  }
  func.func @transform_24(%arg0: i32) -> (i32, i32) {
    %c0_i32 = arith.constant 0 : i32
    %c0_i32_0 = arith.constant 0 : i32
    %c0_i32_1 = arith.constant 0 : i32
    return %c0_i32, %c0_i32_0 : i32, i32
  }
}

</mosaic_0001>

<bundles_post_ra>
// kernel: tpu_custom_call.1
= control target key start
LH: loop header
LB: loop body
LE: loop exit
PB: predicated region body
PF: predicated region fallthrough
CT: control target
= control target key end

     0   :  { %s3517_s0 = inlined_call_operand.vmem [shape: f32[8,8], index: 0, kind: input, shape index: {}]   ;;  %s3518_s1 = inlined_call_operand.vmem [shape: f32[8,128], index: 1, kind: input, shape index: {}]   ;;  %s3519_s2 = inlined_call_operand.vmem [shape: f32[48,4], index: 2, kind: input, shape index: {}]   ;;  %s3520_s3 = inlined_call_operand.vmem [shape: s32[48,1], index: 3, kind: input, shape index: {}]   ;;  %s3521_s4 = inlined_call_operand.vmem [shape: s32[48,1], index: 4, kind: input, shape index: {}]   ;;  %s3522_s5 = inlined_call_operand.vmem [shape: f32[8,128], index: 5, kind: input, shape index: {}]   ;;  %s3523_s6 = inlined_call_operand.vmem [shape: f32[8,128], index: 6, kind: input, shape index: {}]   ;;  %s3524_s7 = inlined_call_operand.vmem [shape: f32[4,128], index: 7, kind: input, shape index: {}]   ;;  %s3525_s8 = inlined_call_operand.vmem [shape: f32[1,128], index: 8, kind: input, shape index: {}]   ;;  %s3526_s9 = inlined_call_operand.vmem [shape: f32[1,128], index: 9, kind: input, shape index: {}]   ;;  %s3527_s10 = inlined_call_operand.vmem [shape: f32[128,128], index: 10, kind: input, shape index: {}]   ;;  %s3528_s11 = inlined_call_operand.vmem [shape: f32[1,128], index: 11, kind: input, shape index: {}]   ;;  %s3529_s12 = inlined_call_operand.vmem [shape: f32[128,128], index: 12, kind: input, shape index: {}]   ;;  %s3530_s13 = inlined_call_operand.vmem [shape: f32[1,128], index: 13, kind: input, shape index: {}]   ;;  %s3531_s14 = inlined_call_operand.vmem [shape: f32[2,1], index: 14, kind: input, shape index: {}]   ;;  %s3532_s15 = inlined_call_operand.vmem [shape: f32[3,3], index: 15, kind: input, shape index: {}]   ;;  %s3533_s16 = inlined_call_operand.vmem [shape: f32[1,3], index: 16, kind: input, shape index: {}]   ;;  %s3534_s17 = inlined_call_operand.vmem [shape: f32[8,128], index: 17, kind: input, shape index: {}]   ;;  %s3535_s18 = inlined_call_operand.hbm [shape: f32[128,128], index: 18, kind: input, shape index: {}]   ;;  %s3536_s19 = inlined_call_operand.vmem [shape: f32[3,128], index: 19, kind: input, shape index: {}]   ;;  %s3537_s20 = inlined_call_operand.vmem [shape: f32[1,128], index: 20, kind: input, shape index: {}]   ;;  %s3538_s21 = inlined_call_operand.vmem [shape: f32[128,8], index: 21, kind: input, shape index: {}]   ;;  %s3539_s22 = inlined_call_operand.vmem [shape: f32[1,8], index: 22, kind: input, shape index: {}]   ;;  %s3540_s23 = inlined_call_operand.hbm [shape: f32[48,128], index: 23, kind: output, shape index: {0}]   ;;  %s3541_s24 = inlined_call_operand.hbm [shape: f32[8,11], index: 24, kind: output, shape index: {1}]  }
   0x1   :  { %3558 = sst [smem:[#allocation23_spill]] %s3517_s0 }
   0x2   :  { %3559 = sst [smem:[#allocation24_spill]] %s3518_s1 }
   0x3   :  { %3560 = sst [smem:[#allocation25_spill]] %s3519_s2 }
   0x4   :  { %3561 = sst [smem:[#allocation26_spill]] %s3520_s3 }
   0x5   :  { %3562 = sst [smem:[#allocation27_spill]] %s3521_s4 }
   0x6   :  { %3563 = sst [smem:[#allocation28_spill]] %s3522_s5 }
   0x7   :  { %3564 = sst [smem:[#allocation29_spill]] %s3523_s6 }
   0x8   :  { %3565 = sst [smem:[#allocation30_spill]] %s3524_s7 }
   0x9   :  { %3566 = sst [smem:[#allocation31_spill]] %s3525_s8 }
   0xa   :  { %3567 = sst [smem:[#allocation32_spill]] %s3535_s18 }
   0xb   :  { %3568 = sst [smem:[#allocation33_spill]] %s3539_s22 }
   0xc   :  { %3569 = sst [smem:[#allocation34_spill]] %s3540_s23 }
   0xd   :  { %3570 = sst [smem:[#allocation35_spill]] %s3541_s24 }
   0xe   :  { %30 = vsyncpa [#allocation7], 0 }
   0xf   :  { %31 = vsyncpa [#allocation8], 0 }
  0x10   :  { %33 = vsyncpa [#allocation8 + $0x1], 0 }
  0x11   :  { %34 = vsyncpa [#allocation11], 0  ;;  %s3035_s5 = smov 0   ;;  %s3037_s26 = smov 0  }
  0x12   :  { %s3039_s27 = smov 0   ;;  %s3041_s28 = smov 0  }
  0x13 LB: > { %3571 = sst [smem:[#allocation15_spill]] %s2878_s5  ;;  %s3056_s6 = sadd.s32 4294967295, %s2890_s28   ;;  %s2890_s28 = sphi %s3041_s28, %s3616_s28   ;;  %s2886_s27 = sphi %s3039_s27, %s3619_s27   ;;  %s2882_s26 = sphi %s3037_s26, %s3618_s26   ;;  %s2878_s5 = sphi %s3035_s5, %s3617_s5  }
  0x14   : > { %3572 = sst [smem:[#allocation16_spill]] %s2882_s26  ;;  %s2238_s2 = sadd.s32 4294967294, %s2890_s28  }
  0x15   : > { %3573 = sst [smem:[#allocation17_spill]] %s2886_s27  ;;  %s3060_s29 = sadd.s32 1, %s2890_s28  }
  0x16   : > { %3574 = sst [smem:[#allocation18_spill]] %s2890_s28  ;;  %s545_s0 = sadd.s32 1, %s2886_s27 }
  0x17   : > { %3575 = sst [smem:[#allocation19_spill]] %s3060_s29  ;;  %s542_s7 = ssub.s32 %s2890_s28, %s3060_s29 }
  0x18   : > { %p555_p0 = scmp.ne.s32.totalorder %s2886_s27, %s2882_s26  ;;  %p543_p1 = scmp.eq.s32.totalorder %s542_s7, 0 }
  0x19   : > { %p3547_p2 = scmp.eq.s32.totalorder %s3056_s6, 2  ;;  %p561_p3 = scmp.ne.s32.totalorder %s2882_s26, %s2878_s5 }
  0x1a   : > { %p562_p4 = scmp.eq.s32.totalorder %s2238_s2, 2  ;;  %p2239_p7 = scmp.ge.s32.totalorder %s2890_s28, 1 }
  0x1b   : > { %s3071_s30 = scalar_select %p543_p1, %s2886_s27, %s545_s0  }
  0x1c   : > { %p3075_p5 = por %p3547_p2, %p555_p0  ;;  %p3079_p6 = por %p562_p4, %p561_p3 }
  0x1d   : > { %3576 = sst [smem:[#allocation20_spill]] %s3071_s30  ;;  %p590_p8 = scmp.lt.s32.totalorder %s2890_s28, 4 }
  0x1e   : > { %s3577_s3 = scalar_select %p3075_p5, 1, 0 }
  0x1f   : > { %s3579_s25 = scalar_select %p3079_p6, 1, 0 }
  0x20   : > { %3578 = sst [smem:[#allocation21_spill]] %s3577_s3  ;;  %p3548_p10 = scmp.eq.s32.totalorder %s3056_s6, 0 }
  0x21   : > { %3580 = sst [smem:[#allocation22_spill]] %s3579_s25  ;;  %p3087_p11 = pnand %p2239_p7, %p590_p8 }
  0x22   : > { %s2892_s4 = smov [#allocation6]   ;;  %s3583_s18 = sld [smem:[#allocation32_spill]] }
  0x23   : > { %s3581_s8 = scalar_select %p3087_p11, 1, 0 }
  0x24   : > { %s647_s1 = sshll.u32 %s2892_s4, 4  ;;  %p2694_p12 = pneg %p3087_p11  ;;  %s648_s1 = int_to_ptr.vmem [resolvable:$true] %s647_s1 }
  0x26   : > { %p3095_p13 = pnand %p3548_p10, %p2694_p12 }
  0x28   : > { %s2766_s30 = scalar_lea.hbm %s3583_s18, 2048  ;;  %p2768_p1 = pneg %p3095_p13 }
  0x29   : > { %p2767_p0 = scmp.ne.s32.totalorder %s3583_s18, %s2766_s30  ;;  %p2773_p7 = scmp.lt.u32.totalorder %s2766_s30, %s3583_s18 }
  0x2b   : > { %p2769_p3 = pnand %p2768_p1, %p2767_p0 }
  0x2d   : > { %p2770_p4 = pneg %p2769_p3 }
  0x2f   : > { %p2775_p8 = pnand %p2773_p7, %p2770_p4 }
  0x31   : > { %2778 = shalt.err (!%p2775_p8)
}
  0x32   : > { %s2779_s5 = scalar_lea.vmem %s648_s1, 2048  ;;  %p2787_p10 = scmp.lt.s32.totalorder %s648_s1, %s648_s1 }
  0x33   : > { %p2780_p12 = scmp.ne.s32.totalorder %s648_s1, %s2779_s5  ;;  %p2788_p6 = scmp.lt.s32.totalorder %s2779_s5, %s2779_s5 }
  0x35   : > { %p2782_p2 = pnand %p2780_p12, %p2768_p1  ;;  %p2789_p5 = por %p2788_p6, %p2787_p10 }
  0x37   : > { %p2783_p9 = pneg %p2782_p2 }
  0x39   : > { %p2790_p11 = pnand %p2789_p5, %p2783_p9 }
  0x3b   : > { %2793 = shalt.err (!%p2790_p11)
}
  0x3c   : > { %s2893_s27 = smov 128   ;;  %s2894_s29 = smov 8  }
  0x3d   : > { %2697 = dma.hbm_to_vmem [thread:$0]  (!%p3095_p13), %s3583_s18, 2048, %s648_s1, [#allocation7], %s2893_s27, %s2893_s27, %s2894_s29  }
  0x3e   : > { %p3584_p0 = scmp.ne.s32.totalorder %s3581_s8, 0 }
  0x3f   : > { %p3585_p3 = scmp.eq.s32.totalorder (!%p3584_p0), %s3056_s6, 0 }
  0x40   : > { %702 = sbr.rel (%p3584_p0) target bundleno = 2464 (0x9a0), region = 112 }
  0x47   : > { %2865 = dma.done.wait (%p3585_p3), [#allocation7], 2048   ;;  %p3586_p2 = pmov %p3585_p3 }
  0x48   : > { %s3557_s5 = sand.u32 1, %s2882_s26   ;;  %s2245_s30 = sshll.u32 %s3056_s6, 1 }
  0x49   : > { %2867 = vsyncadd (%p3586_p2), [#allocation7], 4294965248  ;;  %s2244_s25 = sshll.u32 %s3557_s5, 4  ;;  %p779_p5 = scmp.lt.s32.totalorder %s2245_s30, 5 }
  0x4a   : > { %s3587_s8 = sld [smem:[#allocation25_spill]]  ;;  %s3588_s7 = sld [smem:[#allocation26_spill]] }
  0x4b   : > { %s3621_s30 = smov (!%p779_p5, %s2245_s30), 5  ;;  %s3589_s23 = sld [smem:[#allocation27_spill]] }
  0x4c   : > { %s2246_s2 = sshll.u32 %s3621_s30, 3  ;;  %s3140_s26 = scalar_lea.vmem [#allocation9], %s2244_s25 }
  0x4d   : > { %p3590_p6 = scmp.ne.s32.totalorder %s3056_s6, 0 }
  0x4e   : > { %s3591_s1 = sld [smem:[#allocation28_spill]] (!%p3590_p6)  ;;  %s3592_s22 = sld [smem:[#allocation29_spill]] (!%p3590_p6)  ;;  %v955_v2 = vlaneseq (!%p3590_p6)  ;;  %v2895_v3 = vmov (!%p3590_p6), 0.0   ;;  %vm804_vm0 = vcmask (!%p3590_p6), 64512   ;;  %vm2896_vm1 = vmmov (!%p3590_p6), 0  }
  0x4f   : > { %801 = sbr.rel (%p3590_p6) target bundleno = 302 (0x12e), region = 120  ;;  %2377 = vmatprep.subr.mxu0 (!%p3590_p6), %v2895_v3  ;;  %953 = vst [vmem:[#allocation4] sm:$0xff] (!%p3590_p6), %v2895_v3  ;;  %954 = vst [vmem:[#allocation4 + $0x8] sm:$0xff] (!%p3590_p6), %v2895_v3  ;;  %2382 = vmatprep.subr.mxu1 (!%p3590_p6), %v2895_v3  ;;  %s3593_s28 = sld [smem:[#allocation23_spill]] (!%p3590_p6) }
  0x50   : > { %s3128_s27 = scalar_lea.vmem %s3587_s8, %s2246_s2  ;;  %s3133_s18 = scalar_lea.vmem %s3588_s7, %s2246_s2  ;;  %2379 = vmatprep.mubr.msk.f32.mxu0 (!%p3590_p6), %vm2896_vm1, %v2895_v3  ;;  %v956_v5 = vand.u32 (!%p3590_p6), 127, %v955_v2  ;;  %2384 = vmatprep.mubr.msk.f32.mxu1 (!%p3590_p6), %vm2896_vm1, %v2895_v3 }
  0x51   : > { %s3138_s3 = scalar_lea.vmem %s3589_s23, %s2246_s2 }
  0x52   : > { %957 = vst.msk [vmem:[#allocation5] sm:$0xff] (!%p3590_p6), %vm804_vm0, %v956_v5  ;;  %958 = vst.msk [vmem:[#allocation5 + $0x8] sm:$0xff] (!%p3590_p6), %vm804_vm0, %v956_v5 }
  0x54   : > { %v803_v0 = vld [vmem:[%s3591_s1] sm:$0xff] (!%p3590_p6) }
  0x55   : > { %v880_v1 = vld [vmem:[%s3592_s22] sm:$0xff] (!%p3590_p6)  ;;  %2378 = vmatpush3.msra.mxu0 (!%p3590_p6), %v803_v0 }
  0x56   : > { %v802_v4 = vld [vmem:[%s3593_s28] sm:$0xff]  ;;  %2383 = vmatpush3.msra.mxu1 %v880_v1 }
  0x57   : > { %2380 = vmatmul.mubr.msk.f32.vlgmr.msra.gmra.mrb[0].mxu0 %vm804_vm0, %v802_v4  ;;  %2385 = vmatmul.mubr.msk.f32.vlgmr.msra.gmra.mrb[0].mxu1 %vm804_vm0, %v802_v4 }
 0x12a   : > { %v874_v6 = vpop.f32.mrb[0].mxu0  ;;  %v947_v7 = vpop.f32.mrb[0].mxu1 }
 0x12b   : > { %v878_v8 = vpack.c.bf16 %v874_v6, %v874_v6  ;;  %v951_v9 = vpack.c.bf16 %v947_v7, %v947_v7  ;;  %v2381_v10 = vpop.f32.mrb[1].mxu0  ;;  %v2386_v11 = vpop.f32.mrb[1].mxu1 }
 0x12d   : > { %879 = vst [vmem:[#allocation2] sm:$0xf] %v878_v8  ;;  %952 = vst [vmem:[#allocation3] sm:$0xf] %v951_v9 }
 0x12e PF: > { %v960_v12 = vld [vmem:[%s3133_s18 + $0x8] sm:$0xff]  ;;  %v959_v13 = vld [vmem:[%s3133_s18] sm:$0xff]  ;;  %v2897_v14 = vmov 0   ;;  %v2898_v17 = vmov 0.0   ;;  %vm999_vm2 = vcmask 1043456   ;;  %s3594_s18 = sld [smem:[#allocation24_spill]] }
 0x12f   : > { %2757 = vset.pattern.permute.xlu1 %v2897_v14  ;;  %2756 = vset.pattern.permute.xlu0 %v2897_v14  ;;  %v962_v15 = vld [vmem:[%s3138_s3 + $0x8] sm:$0xff]  ;;  %v961_v16 = vld [vmem:[%s3138_s3] sm:$0xff]  ;;  %vm2899_vm3 = vmmov 0   ;;  %s3595_s2 = sld [smem:[#allocation30_spill]]  ;;  %vm995_vm8 = vcmask 64512   ;;  %vm1202_vm9 = vcmask 31744  }
 0x130   : > { %971 = vperm.xlu1 %2757, %v960_v12   ;;  %968 = vperm.xlu0 %2756, %v959_v13   ;;  %v963_v37 = vld [vmem:[%s3128_s27] sm:$0xff]  ;;  %v964_v38 = vld [vmem:[%s3128_s27 + $0x8] sm:$0xff]  ;;  %v1313_v42 = vld [vmem:[%s3527_s10 + $0x10] sm:$0xff]  ;;  %s3596_s22 = sld [smem:[#allocation31_spill]]  ;;  %s2900_s30 = smov 1   ;;  %vm1584_vm14 = vcmask 130048  }
 0x131   : > { %2387 = vmatprep.subr.bf16.mxu0 %v2898_v17  ;;  %2389 = vmatprep.mubr.msk.bf16.mxu0 %vm2899_vm3, %v2898_v17  ;;  %v966_v22 = vld [vmem:[#allocation5 + $0x8] sm:$0xff]  ;;  %v965_v24 = vld [vmem:[#allocation5] sm:$0xff]  ;;  %v1312_v41 = vld [vmem:[%s3527_s10 + $0x8] sm:$0xff]  ;;  %s2901_s23 = smov 127   ;;  %p2270_p9 = scmp.ne.s32.totalorder %s3056_s6, 2 }
 0x132   : > { %v1311_v40 = vld [vmem:[%s3527_s10] sm:$0xff]  ;;  %v1314_v44 = vld [vmem:[%s3527_s10 + $0x18] sm:$0xff]  ;;  %v1316_v47 = vld [vmem:[%s3527_s10 + $0x28] sm:$0xff]  ;;  %vm1684_vm15 = vcmask (!%p2270_p9), 1042432   ;;  %vm2903_vm0 = vmmov (!%p2270_p9), 0   ;;  %vm1680_vm1 = vcmask (!%p2270_p9), 23552  }
 0x133   : > { %v2564_v43 = vpack.c.bf16 %v1312_v41, %v1311_v40  ;;  %v2568_v45 = vpack.c.bf16 %v1314_v44, %v1313_v42  ;;  %v1315_v46 = vld [vmem:[%s3527_s10 + $0x20] sm:$0xff]  ;;  %v1317_v49 = vld [vmem:[%s3527_s10 + $0x30] sm:$0xff]  ;;  %v1318_v50 = vld [vmem:[%s3527_s10 + $0x38] sm:$0xff]  ;;  %s3598_s0 = sld [smem:[#allocation23_spill]] (!%p2270_p9)  ;;  %s2905_s3 = smov (!%p2270_p9), 8  }
 0x134   : > { %v994_v18 = vld [vmem:[#allocation3] sm:$0xf]  ;;  %983 = vperm.xlu1 %2757, %v962_v15   ;;  %980 = vperm.xlu0 %2756, %v961_v16   ;;  %v993_v28 = vld [vmem:[#allocation2] sm:$0xf]  ;;  %v2572_v48 = vpack.c.bf16 %v1316_v47, %v1315_v46  ;;  %v2576_v51 = vpack.c.bf16 %v1318_v50, %v1317_v49  ;;  %v1320_v53 = vld [vmem:[%s3527_s10 + $0x48] sm:$0xff]  ;;  %s3599_s24 = sld [smem:[#allocation33_spill]] (!%p2270_p9) }
 0x135   : > { %v1001_v19 = vsel %vm999_vm2, %v994_v18, 0  ;;  %v1046_v20 = vld [vmem:[%s3594_s18] sm:$0xff]  ;;  %v1158_v36 = vsel %vm999_vm2, %v993_v28, 0  ;;  %v1321_v55 = vld [vmem:[%s3527_s10 + $0x50] sm:$0xff]  ;;  %v1322_v56 = vld [vmem:[%s3527_s10 + $0x58] sm:$0xff]  ;;  %s3597_s18 = sld [smem:[#allocation24_spill]] (!%p2270_p9) }
 0x136   : > { %2388 = vmatpush3.bf16.msra.mxu0 %v1001_v19  ;;  %2393 = vmatprep.subr.mxu1 %v1046_v20  ;;  %v1201_v21 = vld [vmem:[%s3595_s2] sm:$0xf]  ;;  %v2584_v57 = vpack.c.bf16 %v1322_v56, %v1321_v55  ;;  %v1324_v7 = vld [vmem:[%s3527_s10 + $0x68] sm:$0xff]  ;;  %v1325_v9 = vld [vmem:[%s3527_s10 + $0x70] sm:$0xff] }
 0x137   : > { %2398 = vmatprep.subr.bf16.mxu0 %v2898_v17  ;;  %2394 = vmatpush3.msra.mxu1 %v1046_v20  ;;  %v1319_v52 = vld [vmem:[%s3527_s10 + $0x40] sm:$0xff]  ;;  %v1326_v10 = vld [vmem:[%s3527_s10 + $0x78] sm:$0xff]  ;;  %v1412_v13 = vld [vmem:[%s3529_s12 + $0x8] sm:$0xff] }
 0x138   : > { %2404 = vmatprep.subr.msk.mxu1 %vm999_vm2, %v1201_v21  ;;  %v2580_v54 = vpack.c.bf16 %v1320_v53, %v1319_v52  ;;  %v1323_v6 = vld [vmem:[%s3527_s10 + $0x60] sm:$0xff]  ;;  %v2592_v11 = vpack.c.bf16 %v1326_v10, %v1325_v9  ;;  %v1413_v14 = vld [vmem:[%s3529_s12 + $0x10] sm:$0xff]  ;;  %v1414_v16 = vld [vmem:[%s3529_s12 + $0x18] sm:$0xff] }
 0x139   : > { %v2588_v8 = vpack.c.bf16 %v1324_v7, %v1323_v6  ;;  %v1411_v12 = vld [vmem:[%s3529_s12] sm:$0xff]  ;;  %v2600_v18 = vpack.c.bf16 %v1414_v16, %v1413_v14  ;;  %v1416_v20 = vld [vmem:[%s3529_s12 + $0x28] sm:$0xff]  ;;  %v1421_v28 = vld [vmem:[%s3529_s12 + $0x50] sm:$0xff] }
 0x13a   : > { %v2596_v15 = vpack.c.bf16 %v1412_v13, %v1411_v12  ;;  %v1415_v19 = vld [vmem:[%s3529_s12 + $0x20] sm:$0xff]  ;;  %v1426_v49 = vld [vmem:[%s3529_s12 + $0x78] sm:$0xff] }
 0x13b   : > { %v2266_v41 = vld [vmem:[%s3526_s9] ss:$0 sm:$0xff] }
 0x13c   : > { %v1511_v53 = vld [vmem:[%s3531_s14] sm:$0x3] }
 0x13d   : > { %v2267_v55 = vld [vmem:[%s3528_s11] ss:$0 sm:$0xff] }
 0x1af   : > { %v972_v23 = vpop.permute.xlu1 %971  ;;  %v969_v25 = vpop.permute.xlu0 %968 }
 0x1b0   : > { %vm974_vm4 = vcmp.eq.s32.totalorder %v966_v22, %v972_v23  ;;  %vm973_vm5 = vcmp.eq.s32.totalorder %v965_v24, %v969_v25  ;;  %v1418_v23 = vld [vmem:[%s3529_s12 + $0x38] sm:$0xff]  ;;  %v1419_v25 = vld [vmem:[%s3529_s12 + $0x40] sm:$0xff] }
 0x1b1   : > { %v3170_v29 = vsel %vm974_vm4, 1.0, %v2898_v17  ;;  %v3173_v30 = vsel %vm973_vm5, 1.0, %v2898_v17 }
 0x1b2   : > { %v991_v39 = vpack.c.bf16 %v3170_v29, %v3173_v30 }
 0x1b3   : > { %v984_v26 = vpop.permute.xlu1 %983  ;;  %v981_v27 = vpop.permute.xlu0 %980 }
 0x1b4   : > { %vm986_vm6 = vcmp.eq.s32.totalorder %v966_v22, %v984_v26  ;;  %vm985_vm7 = vcmp.eq.s32.totalorder %v965_v24, %v981_v27  ;;  %v1417_v22 = vld [vmem:[%s3529_s12 + $0x30] sm:$0xff]  ;;  %v1420_v26 = vld [vmem:[%s3529_s12 + $0x48] sm:$0xff] }
 0x1b5   : > { %v2257_v31 = vsel %vm986_vm6, 1.0, %v2898_v17  ;;  %v2256_v32 = vsel %vm985_vm7, 1.0, %v2898_v17  ;;  %v2608_v24 = vpack.c.bf16 %v1418_v23, %v1417_v22  ;;  %v2612_v27 = vpack.c.bf16 %v1420_v26, %v1419_v25 }
 0x1b6   : > { %v1045_v33 = vsub.f32 %v3170_v29, %v2257_v31  ;;  %v992_v34 = vpack.c.bf16 %v2257_v31, %v2256_v32  ;;  %v1044_v35 = vsub.f32 %v3173_v30, %v2256_v32  ;;  %v1422_v31 = vld [vmem:[%s3529_s12 + $0x58] sm:$0xff] }
 0x1b7   : > { %v2616_v32 = vpack.c.bf16 %v1422_v31, %v1421_v28 }
 0x1b8   : > { %2390 = vmatmul.mubr.msk.bf16.vlgmr.msra.gmra.mrb[0].mxu0 %vm995_vm8, %v992_v34  ;;  %2395 = vmatprep.mubr.msk.f32.mxu1 %vm995_vm8, %v1044_v35  ;;  %v1424_v34 = vld [vmem:[%s3529_s12 + $0x68] sm:$0xff] }
 0x1b9   : > { %2396 = vmatmul.mubr.msk.f32.vlgmr.msra.gmra.mrb[0].mxu1 %vm995_vm8, %v1045_v33  ;;  %2399 = vmatpush3.bf16.msra.mxu0 %v1158_v36  ;;  %v1423_v33 = vld [vmem:[%s3529_s12 + $0x60] sm:$0xff] }
 0x1ba   : > { %2405 = vmatpush3.msk.msra.mxu1 %vm999_vm2, %v1201_v21  ;;  %2406 = vmatprep.mubr.msk.f32.mxu1 %vm1202_vm9, %v963_v37  ;;  %v2604_v21 = vpack.c.bf16 %v1416_v20, %v1415_v19  ;;  %v2620_v35 = vpack.c.bf16 %v1424_v34, %v1423_v33  ;;  %v2265_v37 = vld [vmem:[%s3596_s22] ss:$0 sm:$0xff]  ;;  %vm2102_vm2 = vcmask (!%p2270_p9), 89088  }
 0x1bb   : > { %2400 = vmatprep.mubr.msk.bf16.mxu0 %vm2899_vm3, %v2898_v17  ;;  %2565 = vmatprep.subr.bf16.mxu1 %v2564_v43 }
 0x1bc   : > { %2597 = vmatprep.subr.bf16.mxu0 %v2596_v15 }
 0x1bd   : > { %2407 = vmatmul.mubr.msk.f32.vlgmr.msra.gmra.mrb[2].mxu1 %vm1202_vm9, %v964_v38 }
 0x1be   : > { %2567 = vmatpush3.bf16.msra.mxu1 %v2564_v43 }
 0x1bf   : > { %2569 = vmatprep.subr.bf16.mxu1 %v2568_v45 }
 0x1c2   : > { %2571 = vmatpush3.bf16.msra.mxu1 %v2568_v45 }
 0x1c3   : > { %2573 = vmatprep.subr.bf16.mxu1 %v2572_v48 }
 0x1c4   : > { %2401 = vmatmul.mubr.msk.bf16.vlgmr.msra.gmra.mrb[0].mxu0 %vm995_vm8, %v991_v39 }
 0x1c5   : > { %2599 = vmatpush3.bf16.msra.mxu0 %v2596_v15 }
 0x1c6   : > { %2575 = vmatpush3.bf16.msra.mxu1 %v2572_v48  ;;  %2601 = vmatprep.subr.bf16.mxu0 %v2600_v18  ;;  %v1425_v48 = vld [vmem:[%s3529_s12 + $0x70] sm:$0xff] }
 0x1c7   : > { %2577 = vmatprep.subr.bf16.mxu1 %v2576_v51  ;;  %v2624_v50 = vpack.c.bf16 %v1426_v49, %v1425_v48  ;;  %v1759_v48 = vld [vmem:[#allocation6] sm:$0xff] (!%p2270_p9)  ;;  %v1760_v49 = vld [vmem:[#allocation6 + $0x8] sm:$0xff] (!%p2270_p9) }
 0x1c9   : > { %2603 = vmatpush3.bf16.msra.mxu0 %v2600_v18 }
 0x1ca   : > { %2579 = vmatpush3.bf16.msra.mxu1 %v2576_v51  ;;  %2605 = vmatprep.subr.bf16.mxu0 %v2604_v21  ;;  %v1512_v51 = vlaneseq }
 0x1cb   : > { %2581 = vmatprep.subr.bf16.mxu1 %v2580_v54 }
 0x1cc   : > { %v1513_v52 = vshrl.u32 %v1512_v51, 7  ;;  %v2633_v51 = vpack.c.bf16 (!%p2270_p9), %v1760_v49, %v1759_v48  ;;  %v2277_v48 = vld [vmem:[%s3537_s20] ss:$0 sm:$0xff] (!%p2270_p9) }
 0x1cd   : > { %2607 = vmatpush3.bf16.msra.mxu0 %v2604_v21 }
 0x1ce   : > { %2583 = vmatpush3.bf16.msra.mxu1 %v2580_v54  ;;  %2609 = vmatprep.subr.bf16.mxu0 %v2608_v24  ;;  %v1514_v9 = vsub.s32 0, %v1513_v52 }
 0x1cf   : > { %2585 = vmatprep.subr.bf16.mxu1 %v2584_v57 }
 0x1d0   : > { %v1515_v10 = vrot.slane %v1511_v53, %v1514_v9  ;;  %v1772_v9 = vld [vmem:[#allocation6 + $0x68] sm:$0xff] (!%p2270_p9) }
 0x1d1   : > { %2611 = vmatpush3.bf16.msra.mxu0 %v2608_v24 }
 0x1d2   : > { %2587 = vmatpush3.bf16.msra.mxu1 %v2584_v57  ;;  %2613 = vmatprep.subr.bf16.mxu0 %v2612_v27 }
 0x1d3   : > { %2589 = vmatprep.subr.bf16.mxu1 %v2588_v8 }
 0x1d5   : > { %2615 = vmatpush3.bf16.msra.mxu0 %v2612_v27 }
 0x1d6   : > { %2591 = vmatpush3.bf16.msra.mxu1 %v2588_v8  ;;  %2617 = vmatprep.subr.bf16.mxu0 %v2616_v32 }
 0x1d7   : > { %2593 = vmatprep.subr.bf16.mxu1 %v2592_v11 }
 0x1d9   : > { %2619 = vmatpush3.bf16.msra.mxu0 %v2616_v32 }
 0x1da   : > { %2595 = vmatpush3.bf16.msra.mxu1 %v2592_v11  ;;  %2621 = vmatprep.subr.bf16.mxu0 %v2620_v35 }
 0x1dd   : > { %2623 = vmatpush3.bf16.msra.mxu0 %v2620_v35 }
 0x1de   : > { %2625 = vmatprep.subr.bf16.mxu0 %v2624_v50 }
 0x1e1   : > { %2627 = vmatpush3.bf16.msra.mxu0 %v2624_v50 }
 0x28c   : > { %v3227_v58 = vpop.f32.mrb[0].mxu1 }
 0x28d   : > { %v3229_v59 = vpop.f32.mrb[1].mxu1  ;;  %v1129_v60 = vmul.f32 %v3227_v58, %v3227_v58 }
 0x28e   : > { %v1128_v61 = vmul.f32 %v3229_v59, %v3229_v59 }
 0x28f   : > { %1132 = vadd.xlane.f32.xlu1 %v1129_v60 }
 0x290   : > { %1130 = vadd.xlane.f32.xlu0 %v1128_v61  ;;  %v2408_v62 = vpop.f32.mrb[2].mxu1 }
 0x291   : > { %v1278_v63 = vpop.f32.mrb[3].mxu1 }
 0x297   : > { %v1194_v0 = vpop.f32.mrb[0].mxu0 }
 0x298   : > { %v1287_v1 = vadd.f32 %v1278_v63, %v1194_v0  ;;  %v2402_v2 = vpop.f32.mrb[1].mxu0  ;;  %v2268_v63 = vld [vmem:[%s3530_s13] ss:$0 sm:$0xff] }
 0x299   : > { %v1197_v3 = vpop.f32.mrb[2].mxu0 }
 0x29a   : > { %v1288_v4 = vadd.f32 %v2408_v62, %v1197_v3  ;;  %v2403_v5 = vpop.f32.mrb[3].mxu0 }
 0x31c   : > { %v3289_v36 = vpop.xlane.xlu1 %1132 }
 0x31d   : > { %v3294_v38 = vpop.xlane.xlu0 %1130  ;;  %v1297_v40 = vmul.f32 %v2265_v37, %v3289_v36  ;;  %2758 = vrsqrt.f32 %v3289_v36  ;;  %vm1143_vm10 = vcmp.eq.f32.partialorder %v3289_v36, inf  ;;  %vm1145_vm12 = vcmp.eq.f32.partialorder %v3289_v36, 0.0 }
 0x31e   : > { %v1296_v39 = vmul.f32 %v2265_v37, %v3294_v38  ;;  %2760 = vrsqrt.f32 %v3294_v38  ;;  %vm1136_vm11 = vcmp.eq.f32.partialorder %v3294_v38, inf  ;;  %v1139_v23 = vand.u32 2147483648, %v3294_v38 }
 0x31f   : > { %v1299_v43 = vadd.f32 %v1297_v40, %v1288_v4  ;;  %vm1138_vm13 = vcmp.eq.f32.partialorder %v3294_v38, 0.0  ;;  %v1550_v40 = vld [vmem:[#allocation4] sm:$0xff] }
 0x320   : > { %v1298_v42 = vadd.f32 %v1296_v39, %v1287_v1 }
 0x321   : > { %v1308_v45 = vadd.f32 %v2266_v41, %v1299_v43 }
 0x322   : > { %v1307_v44 = vadd.f32 %v2266_v41, %v1298_v42  ;;  %v1551_v41 = vld [vmem:[#allocation4 + $0x8] sm:$0xff] }
 0x323   : > { %v1310_v47 = vmax.f32 %v1308_v45, 0.0 }
 0x324   : > { %v1309_v46 = vmax.f32 %v1307_v44, 0.0 }
 0x326   : > { %2441 = vmatprep.mubr.f32.mxu1 %v1309_v46  ;;  %v2902_v46 = vmov (!%p2270_p9), 0.0  }
 0x327   : > { %2442 = vmatmul.mubr.f32.vlgmr.msra.gmra.mrb[4].mxu1 %v1310_v47  ;;  %v2759_v18 = vpop.eup %2758  ;;  %v1670_v47 = vld [vmem:[%s3597_s18] sm:$0xff] (!%p2270_p9)  ;;  %2519 = vmatprep.subr.mxu0 (!%p2270_p9), %v2902_v46 }
 0x328   : > { %1652 = vmatprep.mubr.f32.mxu1 %v2898_v17  ;;  %v1520_v17 = vsub.s32 1, %v1513_v52  ;;  %v2761_v19 = vpop.eup %2760  ;;  %v1142_v20 = vmul.f32 %v2759_v18, %v3289_v36  ;;  %v1761_v52 = vld [vmem:[#allocation6 + $0x10] sm:$0xff] (!%p2270_p9)  ;;  %v2271_v18 = vld [vmem:[%s3533_s16] ss:$0 sm:$0xff] (!%p2270_p9) }
 0x329   : > { %v1135_v21 = vmul.f32 %v2761_v19, %v3294_v38 }
 0x32a   : > { %v1521_v54 = vrot.slane %v1511_v53, %v1520_v17  ;;  %v1144_v22 = vsel %vm1143_vm10, %v3289_v36, %v1142_v20  ;;  %v1762_v53 = vld [vmem:[#allocation6 + $0x18] sm:$0xff] (!%p2270_p9)  ;;  %v2904_v17 = vmov (!%p2270_p9), 0.0|0.0  }
 0x32c   : > { %1523 = vrot.lane.b32.xlu0 %v1521_v54, %s2900_s30  ;;  %v2636_v54 = vpack.c.bf16 (!%p2270_p9), %v1762_v53, %v1761_v52  ;;  %v2278_v53 = vld [vmem:[%s3599_s24] ss:$0 sm:$0xff] (!%p2270_p9) }
 0x39e   : > { %v1524_v4 = vpop.permute.xlu0 %1523 }
 0x3fa   : > { %v2443_v56 = vpop.f32.mrb[4].mxu1 }
 0x3fb   : > { %v1406_v57 = vadd.f32 %v2443_v56, %v2267_v55  ;;  %v1400_v60 = vpop.f32.mrb[5].mxu1  ;;  %v1764_v56 = vld [vmem:[#allocation6 + $0x28] sm:$0xff] (!%p2270_p9) }
 0x3fc   : > { %v1401_v61 = vadd.f32 %v2267_v55, %v1400_v60  ;;  %v1763_v55 = vld [vmem:[#allocation6 + $0x20] sm:$0xff] (!%p2270_p9)  ;;  %v1667_v60 = vld [vmem:[%s3598_s0] sm:$0xff] (!%p2270_p9) }
 0x3fd   : > { %1410 = vst [vmem:[%s3140_s26 + $0x8] sm:$0xff] %v1406_v57 }
 0x3fe   : > { %1409 = vst [vmem:[%s3140_s26] sm:$0xff] %v1401_v61  ;;  %2476 = vmatprep.mubr.f32.mxu0 %v1401_v61  ;;  %v2628_v62 = vpack.c.bf16 %v1406_v57, %v1401_v61  ;;  %v1918_v61 = vld [vmem:[%s3536_s19] sm:$0x7] (!%p2270_p9) }
 0x3ff   : > { %2477 = vmatmul.mubr.f32.vlgmr.msra.gmra.mrb[4].mxu0 %v1406_v57  ;;  %v1758_v57 = vld [vmem:[%s3534_s17] sm:$0xff] (!%p2270_p9) }
 0x400   : > { %2629 = vmatprep.subr.bf16.mxu1 %v2628_v62  ;;  %2521 = vmatprep.mubr.msk.f32.mxu0 (!%p2270_p9), %vm2903_vm0, %v2902_v46  ;;  %v2639_v62 = vpack.c.bf16 (!%p2270_p9), %v1764_v56, %v1763_v55 }
 0x401   : > { %2520 = vmatpush3.msra.mxu0 (!%p2270_p9), %v1758_v57 }
 0x402   : > { %2524 = vmatprep.subr.mxu0 (!%p2270_p9), %v2902_v46 }
 0x403   : > { %2522 = vmatmul.mubr.msk.f32.vlgmr.msra.gmra.mrb[0].mxu0 (!%p2270_p9), %vm995_vm8, %v1667_v60 }
 0x404   : > { %2525 = vmatpush3.msk.msra.mxu0 (!%p2270_p9), %vm1684_vm15, %v1918_v61  ;;  %2526 = vmatprep.mubr.msk.f32.mxu0 (!%p2270_p9), %vm2903_vm0, %v2902_v46 }
 0x405   : > { %2656 = vmatprep.subr.bf16.mxu0 (!%p2270_p9), %v2904_v17 }
 0x4d2   : > { %v2478_v0 = vpop.f32.mrb[4].mxu0 }
 0x4d3   : > { %v1506_v1 = vadd.f32 %v2478_v0, %v2268_v63  ;;  %v1500_v2 = vpop.f32.mrb[5].mxu0  ;;  %v1766_v0 = vld [vmem:[#allocation6 + $0x38] sm:$0xff] (!%p2270_p9) }
 0x4d4   : > { %v1501_v3 = vadd.f32 %v2268_v63, %v1500_v2  ;;  %v1765_v63 = vld [vmem:[#allocation6 + $0x30] sm:$0xff] (!%p2270_p9)  ;;  %v1767_v2 = vld [vmem:[#allocation6 + $0x40] sm:$0xff] (!%p2270_p9) }
 0x4d5   : > { %v1510_v5 = vmax.f32 %v1506_v1, 0.0  ;;  %v2642_v1 = vpack.c.bf16 (!%p2270_p9), %v1766_v0, %v1765_v63 }
 0x4d6   : > { %v1509_v6 = vmax.f32 %v1501_v3, 0.0  ;;  %v1768_v3 = vld [vmem:[#allocation6 + $0x48] sm:$0xff] (!%p2270_p9) }
 0x4d7   : > { %v1527_v7 = vmul.f32 %v1524_v4, %v1510_v5  ;;  %v1517_v11 = vmul.f32 %v1515_v10, %v1510_v5  ;;  %v1769_v5 = vld [vmem:[#allocation6 + $0x50] sm:$0xff] (!%p2270_p9) }
 0x4d8   : > { %v1526_v8 = vmul.f32 %v1524_v4, %v1509_v6  ;;  %v1516_v13 = vmul.f32 %v1515_v10, %v1509_v6  ;;  %v2645_v4 = vpack.c.bf16 (!%p2270_p9), %v1768_v3, %v1767_v2  ;;  %v1770_v6 = vld [vmem:[#allocation6 + $0x58] sm:$0xff] (!%p2270_p9) }
 0x4d9   : > { %1532 = vrot.lane.b32.xlu0 %v1527_v7, %s2901_s23  ;;  %v2648_v7 = vpack.c.bf16 (!%p2270_p9), %v1770_v6, %v1769_v5 }
 0x4da   : > { %1530 = vrot.lane.b32.xlu1 %v1526_v8, %s2901_s23  ;;  %v1771_v8 = vld [vmem:[#allocation6 + $0x60] sm:$0xff] (!%p2270_p9) }
 0x4db   : > { %v2651_v10 = vpack.c.bf16 (!%p2270_p9), %v1772_v9, %v1771_v8 }
 0x54b   : > { %v1533_v12 = vpop.permute.xlu0 %1532 }
 0x54c   : > { %v1537_v14 = vadd.f32 %v1533_v12, %v1517_v11  ;;  %v1531_v15 = vpop.permute.xlu1 %1530  ;;  %v1773_v11 = vld [vmem:[#allocation6 + $0x70] sm:$0xff] (!%p2270_p9)  ;;  %v1774_v12 = vld [vmem:[#allocation6 + $0x78] sm:$0xff] (!%p2270_p9) }
 0x54d   : > { %v1536_v16 = vadd.f32 %v1531_v15, %v1516_v13  ;;  %v2654_v13 = vpack.c.bf16 (!%p2270_p9), %v1774_v12, %v1773_v11  ;;  %v2005_v15 = vld [vmem:[%s3538_s21] sm:$0xff] (!%p2270_p9) }
 0x54e   : > { %1545 = vperm.xlu0 %2756, %v1537_v14  }
 0x54f   : > { %1540 = vperm.xlu1 %2757, %v1536_v16   ;;  %v2006_v16 = vld [vmem:[%s3538_s21 + $0x8] sm:$0xff] (!%p2270_p9) }
 0x550   : > { %v2657_v20 = vpack.c.bf16 (!%p2270_p9), %v2006_v16, %v2005_v15 }
 0x578   : > { %1552 = vxpose.xlu1.b32.start [1/2] (short) (narrow) %v3173_v30, 8  ;;  %v1146_v30 = vand.u32 2147483648, %v3289_v36 }
 0x57a   : > { %v1147_v24 = vsel %vm1145_vm12, %v1146_v30, %v1144_v22  ;;  %v2007_v30 = vld [vmem:[%s3538_s21 + $0x10] sm:$0xff] (!%p2270_p9) }
 0x57b   : > { %v1149_v26 = vadd.f32 1.0, %v1147_v24  ;;  %v1914_v24 = vpop.f32.mrb[0].mxu0 (!%p2270_p9) }
 0x57c   : > { %1553 = vxpose.xlu1.b32.end [2/2] (short) (narrow) %v3170_v29, 8  ;;  %v1137_v29 = vsel %vm1136_vm11, %v3294_v38, %v1135_v21 }
 0x57d   : > { %v1140_v25 = vsel %vm1138_vm13, %v1139_v23, %v1137_v29  ;;  %2762 = vrcp.f32 %v1149_v26  ;;  %v2008_v29 = vld [vmem:[%s3538_s21 + $0x18] sm:$0xff] (!%p2270_p9)  ;;  %v2010_v26 = vld [vmem:[%s3538_s21 + $0x28] sm:$0xff] (!%p2270_p9) }
 0x57e   : > { %v1148_v27 = vadd.f32 1.0, %v1140_v25  ;;  %v2660_v23 = vpack.c.bf16 (!%p2270_p9), %v2008_v29, %v2007_v30  ;;  %v2009_v25 = vld [vmem:[%s3538_s21 + $0x20] sm:$0xff] (!%p2270_p9) }
 0x580   : > { %2764 = vrcp.f32 %v1148_v27  ;;  %v2523_v27 = vpop.f32.mrb[1].mxu0 (!%p2270_p9) }
 0x587   : > { %v2763_v28 = vpop.eup %2762 }
 0x588   : > { %v1153_v32 = vmul.f32 %v2763_v28, %v3227_v58  ;;  %v1672_v58 = vld [vmem:[%s3532_s15] sm:$0x7] (!%p2270_p9)  ;;  %v2663_v28 = vpack.c.bf16 (!%p2270_p9), %v2010_v26, %v2009_v25 }
 0x58a   : > { %v2765_v31 = vpop.eup %2764 }
 0x58b   : > { %v1151_v34 = vmul.f32 %v2765_v31, %v3229_v59  ;;  %v2011_v31 = vld [vmem:[%s3538_s21 + $0x30] sm:$0xff] (!%p2270_p9) }
 0x5cd   : > { %v1546_v33 = vpop.permute.xlu0 %1545 }
 0x5ce   : > { %v1549_v35 = vmul.f32 %v1546_v33, %v1153_v32  ;;  %v1541_v37 = vpop.permute.xlu1 %1540  ;;  %v2012_v32 = vld [vmem:[%s3538_s21 + $0x38] sm:$0xff] (!%p2270_p9) }
 0x5cf   : > { %v1548_v36 = vmul.f32 %v1541_v37, %v1151_v34  ;;  %v2666_v33 = vpack.c.bf16 (!%p2270_p9), %v2012_v32, %v2011_v31  ;;  %v2013_v34 = vld [vmem:[%s3538_s21 + $0x40] sm:$0xff] (!%p2270_p9) }
 0x5d1   : > { %v2630_v39 = vpack.c.bf16 %v1549_v35, %v1548_v36  ;;  %v2014_v35 = vld [vmem:[%s3538_s21 + $0x48] sm:$0xff] (!%p2270_p9)  ;;  %v2015_v36 = vld [vmem:[%s3538_s21 + $0x50] sm:$0xff] (!%p2270_p9) }
 0x5d2   : > { %v2669_v37 = vpack.c.bf16 (!%p2270_p9), %v2014_v35, %v2013_v34 }
 0x5d3   : > { %2631 = vmatpush1.bf16.msra.mxu1 %v2630_v39  ;;  %v2016_v39 = vld [vmem:[%s3538_s21 + $0x58] sm:$0xff] (!%p2270_p9) }
 0x5d4   : > { %2479 = vmatprep.subr.mxu1 (!%p2270_p9), %v2902_v46 }
 0x5f8   : > { %v1568_v38 = vpop.trf.xlu1 }
 0x5f9   : > { %2269 = vmatmul.mubr.msk.f32.vlgmr.msra.gmra.mrb[6].mxu1 %vm1584_vm14, %v1568_v38  ;;  %v2672_v38 = vpack.c.bf16 (!%p2270_p9), %v2016_v39, %v2015_v36 }
 0x5fa   : > { %2481 = vmatprep.mubr.msk.f32.mxu1 (!%p2270_p9), %vm2903_vm0, %v2902_v46  ;;  %2480 = vmatpush3.msk.msra.mxu1 (!%p2270_p9), %vm1684_vm15, %v1672_v58  ;;  %v2019_v58 = vld [vmem:[%s3538_s21 + $0x70] sm:$0xff] (!%p2270_p9) }
 0x5fb   : > { %2632 = vmatprep.subr.bf16.mxu1 (!%p2270_p9), %v2904_v17 }
 0x6ca   : > { %1666 = sbr.rel (%p2270_p9) target bundleno = 2401 (0x961), region = 124 }
 0x6cc   : > { %v1654_v42 = vpop.f32.mrb[6].mxu1 }
 0x6cd   : > { %v1659_v43 = vadd.f32 %v1654_v42, %v1550_v40  ;;  %v1656_v44 = vpop.f32.mrb[7].mxu1 }
 0x6ce   : > { %v1660_v45 = vadd.f32 %v1656_v44, %v1551_v41  ;;  %v2018_v44 = vld [vmem:[%s3538_s21 + $0x68] sm:$0xff] (!%p2270_p9) }
 0x6cf   : > { %1661 = vst [vmem:[#allocation4] sm:$0xff] %v1659_v43  ;;  %v2017_v43 = vld [vmem:[%s3538_s21 + $0x60] sm:$0xff] (!%p2270_p9) }
 0x6d0   : > { %1662 = vst [vmem:[#allocation4 + $0x8] sm:$0xff] %v1660_v45  ;;  %v2675_v45 = vpack.c.bf16 (!%p2270_p9), %v2018_v44, %v2017_v43 }
 0x6d6   : > { %v1668_v59 = vld [vmem:[#allocation4] sm:$0xff] }
 0x6d7   : > { %v1671_v50 = vadd.f32 %v1670_v47, %v1668_v59  ;;  %v1669_v14 = vld [vmem:[#allocation4 + $0x8] sm:$0xff]  ;;  %v2020_v59 = vld [vmem:[%s3538_s21 + $0x78] sm:$0xff] }
 0x6d9   : > { %2482 = vmatmul.mubr.msk.f32.vlgmr.msra.gmra.mrb[0].mxu1 %vm1680_vm1, %v1671_v50 }
 0x6da   : > { %2634 = vmatpush3.bf16.msra.mxu1 %v2633_v51  ;;  %2516 = vmatprep.mubr.msk.f32.mxu1 %vm2903_vm0, %v2902_v46 }
 0x6db   : > { %2635 = vmatprep.subr.bf16.mxu1 %v2904_v17 }
 0x6de   : > { %2637 = vmatpush3.bf16.msra.mxu1 %v2636_v54 }
 0x6df   : > { %2638 = vmatprep.subr.bf16.mxu1 %v2904_v17 }
 0x6e2   : > { %2640 = vmatpush3.bf16.msra.mxu1 %v2639_v62 }
 0x6e3   : > { %2641 = vmatprep.subr.bf16.mxu1 %v2904_v17 }
 0x6e6   : > { %2643 = vmatpush3.bf16.msra.mxu1 %v2642_v1 }
 0x6e7   : > { %2644 = vmatprep.subr.bf16.mxu1 %v2904_v17 }
 0x6ea   : > { %2646 = vmatpush3.bf16.msra.mxu1 %v2645_v4 }
 0x6eb   : > { %2647 = vmatprep.subr.bf16.mxu1 %v2904_v17 }
 0x6ee   : > { %2649 = vmatpush3.bf16.msra.mxu1 %v2648_v7 }
 0x6ef   : > { %2650 = vmatprep.subr.bf16.mxu1 %v2904_v17 }
 0x6f2   : > { %2652 = vmatpush3.bf16.msra.mxu1 %v2651_v10 }
 0x6f3   : > { %2653 = vmatprep.subr.bf16.mxu1 %v2904_v17 }
 0x6f6   : > { %2655 = vmatpush3.bf16.msra.mxu1 %v2654_v13 }
 0x6f9   : > { %2517 = vmatmul.mubr.f32.vlgmr.msra.gmra.mrb[2].mxu1 %v1669_v14 }
 0x7ac   : > { %v1754_v19 = vpop.f32.mrb[0].mxu1 }
 0x7ad   : > { %v1755_v21 = vadd.f32 %v2271_v18, %v1754_v19  ;;  %v2483_v22 = vpop.f32.mrb[1].mxu1 }
 0x7af   : > { %2527 = vmatmul.mubr.msk.f32.vlgmr.msra.gmra.mrb[2].mxu0 %vm1680_vm1, %v1755_v21  ;;  %2098 = vrot.lane.b32.xlu0 %v1755_v21, %s2905_s3 }
 0x7b0   : > { %2658 = vmatpush3.bf16.msra.mxu0 %v2657_v20  ;;  %2561 = vmatprep.mubr.msk.f32.mxu0 %vm2903_vm0, %v2902_v46  ;;  %v2678_v46 = vpack.c.bf16 %v2020_v59, %v2019_v58 }
 0x7b1   : > { %2659 = vmatprep.subr.bf16.mxu0 %v2904_v17 }
 0x7b4   : > { %2661 = vmatpush3.bf16.msra.mxu0 %v2660_v23 }
 0x7b5   : > { %2662 = vmatprep.subr.bf16.mxu0 %v2904_v17 }
 0x7b8   : > { %2664 = vmatpush3.bf16.msra.mxu0 %v2663_v28 }
 0x7b9   : > { %2665 = vmatprep.subr.bf16.mxu0 %v2904_v17 }
 0x7bc   : > { %2667 = vmatpush3.bf16.msra.mxu0 %v2666_v33 }
 0x7bd   : > { %2668 = vmatprep.subr.bf16.mxu0 %v2904_v17 }
 0x7c0   : > { %2670 = vmatpush3.bf16.msra.mxu0 %v2669_v37 }
 0x7c1   : > { %2671 = vmatprep.subr.bf16.mxu0 %v2904_v17 }
 0x7c4   : > { %2673 = vmatpush3.bf16.msra.mxu0 %v2672_v38 }
 0x7c5   : > { %2674 = vmatprep.subr.bf16.mxu0 %v2904_v17 }
 0x7c8   : > { %2676 = vmatpush3.bf16.msra.mxu0 %v2675_v45 }
 0x7c9   : > { %2677 = vmatprep.subr.bf16.mxu0 %v2904_v17 }
 0x7cc   : > { %v1841_v40 = vpop.f32.mrb[2].mxu1  ;;  %2679 = vmatpush3.bf16.msra.mxu0 %v2678_v46 }
 0x7cd   : > { %v1915_v41 = vadd.f32 %v1914_v24, %v1841_v40  ;;  %v2518_v42 = vpop.f32.mrb[3].mxu1 }
 0x821   : > { %v2099_v56 = vpop.permute.xlu0 %2098 }
 0x882   : > { %v1991_v47 = vpop.f32.mrb[2].mxu0 }
 0x883   : > { %v1995_v49 = vadd.f32 %v1991_v47, %v1915_v41  ;;  %v2528_v50 = vpop.f32.mrb[3].mxu0 }
 0x885   : > { %v2003_v51 = vadd.f32 %v2277_v48, %v1995_v49 }
 0x887   : > { %v2004_v52 = vmax.f32 %v2003_v51, 0.0 }
 0x889   : > { %2562 = vmatmul.mubr.f32.vlgmr.msra.gmra.mrb[4].mxu0 %v2004_v52 }
 0x95c   : > { %v2094_v17 = vpop.f32.mrb[4].mxu0 }
 0x95d   : > { %v2095_v54 = vadd.f32 %v2278_v53, %v2094_v17  ;;  %v2563_v55 = vpop.f32.mrb[5].mxu0 }
 0x95f   : > { %v2101_v57 = vsel %vm995_vm8, %v2095_v54, %v2099_v56 }
 0x960   : > { %2103 = vst.msk [vmem:[#allocation10] sm:$0xff] %vm2102_vm2, %v2101_v57 }
 0x961 PF: > { %s3600_s28 = sld [smem:[#allocation16_spill]]  ;;  %s3601_s22 = sld [smem:[#allocation21_spill]] }
 0x962   : > { %s2286_s5 = sshll.u32 %s3056_s6, 8  ;;  %s3602_s25 = sld [smem:[#allocation34_spill]] }
 0x963   : > { %s2118_s29 = sshll.u32 %s3140_s26, 4  ;;  %s2906_s1 = smov [#allocation9]   ;;  %s3450_s29 = int_to_ptr.vmem [resolvable:$true] %s2118_s29 }
 0x964   : > { %s2794_s30 = scalar_lea.vmem %s3450_s29, 256  ;;  %s2798_s4 = sshll.u32 %s2906_s1, 4  ;;  %s2799_s4 = int_to_ptr.vmem [resolvable:$false] %s2798_s4 }
 0x965   : > { %p2795_p10 = scmp.ne.s32.totalorder %s3450_s29, %s2794_s30  ;;  %s2800_s27 = scalar_lea.vmem %s2799_s4, 512 }
 0x966   : > { %p2801_p4 = scmp.lt.s32.totalorder %s3450_s29, %s2799_s4  ;;  %p2802_p7 = scmp.lt.s32.totalorder %s2800_s27, %s2794_s30 }
 0x967   : > { %s3603_s0 = sand.u32 1, %s3600_s28   ;;  %p3604_p11 = scmp.ne.s32.totalorder %s3601_s22, 0 }
 0x968   : > { %s3447_s2 = scalar_lea.hbm %s3602_s25, %s2286_s5  ;;  %s3454_s7 = scalar_lea.sflag [#allocation8], %s3603_s0 }
 0x969   : > { %p2796_p13 = pnand %p2795_p10, %p3604_p11  ;;  %p2803_p8 = por %p2802_p7, %p2801_p4 }
 0x96b   : > { %p2797_p1 = pneg %p2796_p13 }
 0x96d   : > { %p2804_p12 = pnand %p2803_p8, %p2797_p1 }
 0x96f   : > { %2807 = shalt.err (!%p2804_p12)
}
 0x970   : > { %s2808_s26 = scalar_lea.hbm %s3447_s2, 256  ;;  %s2812_s24 = scalar_lea.hbm %s3602_s25, 768 }
 0x971   : > { %p2809_p0 = scmp.ne.s32.totalorder %s3447_s2, %s2808_s26  ;;  %p2813_p5 = scmp.lt.u32.totalorder %s3447_s2, %s3602_s25 }
 0x972   : > { %p2814_p6 = scmp.lt.u32.totalorder %s2812_s24, %s2808_s26  ;;  %p2816_p10 = scmp.lt.u32.totalorder %s2808_s26, %s3447_s2 }
 0x973   : > { %p2810_p3 = pnand %p2809_p0, %p3604_p11 }
 0x974   : > { %p2815_p9 = por %p2814_p6, %p2813_p5 }
 0x975   : > { %p2811_p2 = pneg %p2810_p3 }
 0x976   : > { %p2817_p13 = por %p2816_p10, %p2815_p9 }
 0x978   : > { %p2818_p1 = pnand %p2817_p13, %p2811_p2 }
 0x97a   : > { %2821 = shalt.err (!%p2818_p1)
}
 0x97b   : > { %s2907_s18 = smov 128   ;;  %s2908_s3 = smov 8  }
 0x97c   : > { %2688 = dma.vmem_to_hbm [thread:$0]  (%p3604_p11), %s3450_s29, 256, %s3447_s2, %s3454_s7, %s2907_s18, %s2907_s18, %s2908_s3  }
 0x97d   : > { %s2909_s0 = smov [#allocation10]   ;;  %p3605_p7 = scmp.eq.s32.totalorder %s3056_s6, 2 }
 0x97e   : > { %s2132_s30 = sshll.u32 %s2909_s0, 4  ;;  %s2133_s30 = int_to_ptr.vmem [resolvable:$true] %s2132_s30 }
 0x97f   : > { %s2822_s1 = scalar_lea.vmem %s2133_s30, 128  ;;  %p2829_p0 = scmp.lt.s32.totalorder %s2133_s30, %s2133_s30 }
 0x980   : > { %p2823_p4 = scmp.ne.s32.totalorder %s2133_s30, %s2822_s1  ;;  %p2830_p3 = scmp.lt.s32.totalorder %s2822_s1, %s2822_s1 }
 0x982   : > { %p2824_p8 = pnand %p2823_p4, %p3605_p7  ;;  %p2831_p2 = por %p2830_p3, %p2829_p0 }
 0x984   : > { %p2825_p12 = pneg %p2824_p8 }
 0x986   : > { %p2832_p5 = pnand %p2831_p2, %p2825_p12 }
 0x988   : > { %2835 = shalt.err (!%p2832_p5)
}
 0x989   : > { %s3606_s26 = sld [smem:[#allocation35_spill]]  ;;  %p3608_p6 = pmov %p3605_p7 }
 0x98f   : > { %s3607_s8 = smov %s3606_s26  ;;  %s2836_s23 = scalar_lea.hbm %s3606_s26, 128 }
 0x990   : > { %p2837_p11 = scmp.ne.s32.totalorder %s3607_s8, %s2836_s23  ;;  %p2842_p13 = scmp.lt.u32.totalorder %s2836_s23, %s3607_s8 }
 0x992   : > { %p2838_p9 = pnand %p2837_p11, %p3608_p6 }
 0x994   : > { %p2839_p10 = pneg %p2838_p9 }
 0x996   : > { %p2844_p1 = pnand %p2842_p13, %p2839_p10 }
 0x998   : > { %2847 = shalt.err (!%p2844_p1)
}
 0x999   : > { %p3609_p4 = pmov %p3608_p6 }
 0x99b   : > { %2690 = dma.vmem_to_hbm [thread:$0]  (%p3609_p4), %s2133_s30, 128, %s3607_s8, [#allocation11]  }
 0x99c   : > { %p3610_p7 = pmov %p3609_p4 }
 0x99d   : > { %p3611_p8 = pmov %p3609_p4 }
 0x99e   : > { %2869 = dma.done.wait (%p3610_p7), [#allocation11], 128  }
 0x99f   : > { %2871 = vsyncadd (%p3611_p8), [#allocation11], 4294967168 }
 0x9a0 PF: > { %s3612_s5 = sld [smem:[#allocation18_spill]]  ;;  %s3613_s18 = sld [smem:[#allocation15_spill]] }
 0x9a1   : > { %s3614_s3 = sld [smem:[#allocation22_spill]] }
 0x9a6   : > { %p2706_p12 = scmp.ge.s32.totalorder %s3612_s5, 2  ;;  %s2148_s0 = sand.u32 1, %s3613_s18  }
 0x9a7   : > { %p3615_p0 = scmp.ne.s32.totalorder %s3614_s3, 0  ;;  %s2149_s1 = scalar_lea.sflag [#allocation8], %s2148_s0 }
 0x9a9   : > { %p2699_p3 = pnand %p2706_p12, %p3615_p0 }
 0x9ab   : > { %2873 = dma.done.wait (!%p2699_p3), %s2149_s1, 256  }
 0x9ac   : > { %2875 = vsyncadd (!%p2699_p3), %s2149_s1, 4294967040  ;;  %s3616_s28 = sld [smem:[#allocation19_spill]]  ;;  %s3617_s5 = sld [smem:[#allocation16_spill]] }
 0x9ad   : > { %s3618_s26 = sld [smem:[#allocation17_spill]]  ;;  %s3619_s27 = sld [smem:[#allocation20_spill]] }
 0x9b2   : > { %p37_p2 = scmp.ge.s32.totalorder %s3616_s28, 5  }
 0x9b4   :  { %39 = sbr.rel (!%p37_p2) target bundleno = 19 (0x13), region = 174 }
 0x9bb   :  { %2154 = vsyncpa [#allocation7], 1 }
 0x9bc   :  { %2156 = vsyncpa [#allocation7 + $0x1], 1 }
 0x9bd   :  { %2157 = vsyncpa [#allocation8], 1 }
 0x9be   :  { %2159 = vsyncpa [#allocation8 + $0x1], 1 }
 0x9bf   :  { %2160 = vsyncpa [#allocation11], 1 }

</bundles_post_ra>
